<compile_context>
chip_gen: v7x
topology: tpu7x:2x2x1
jax: 0.10.0
libtpu: 0.0.40
codegen_flags: <defaults>
</compile_context>

<pallas_src>
import functools

import jax
import jax.numpy as jnp
from jax import lax
from jax.experimental import pallas as pl
from jax.experimental.pallas import tpu as pltpu


def _round_up(x, m):
    return ((x + m - 1) // m) * m


def _bytes(shape, dtype):
    n = 1
    for s in shape:
        n *= int(s)
    return n * jnp.dtype(dtype).itemsize


def _device_kind():
    try:
        return jax.devices()[0].device_kind.lower()
    except Exception:
        return ""


def _num_tensorcores_per_chip():
    kind = _device_kind()
    # v7x has 2 TensorCores per chip, v4 is a 2-core megacore; v5e/v6e are 1-TC.
    return 2 if ("v7" in kind or "v4" in kind) else 1


def _lstm_fused_kernel(x_ref, wih_ref, b_ref, whh_ref, wfc_ref, bfc_ref,
                       out_ref, h_scr, c_scr, *,
                       hidden_pad, time_chunk, seq_len):
    """One time chunk of the LSTM recurrence with the input projection fused in.

    x_ref   : (Tc, tb, Dp)  bf16   input chunk (time-major, zero-padded tail)
    wih_ref : (Dp, 4Hp)     bf16   input->gates weights (transposed, i/f/o/g)
    b_ref   : (1, 4Hp)      f32    b_ih + b_hh (i/f/o/g)
    whh_ref : (Hp, 4Hp)     bf16   hidden->gates weights (transposed, i/f/o/g)
    wfc_ref : (Hp, Op)      bf16   final Linear weights (transposed)
    bfc_ref : (1, Op)       f32    final Linear bias
    out_ref : (tb, Op)      f32    written on the last time chunk
    h_scr/c_scr : (tb, Hp)  f32    recurrent state, persistent across grid steps
    """
    t = pl.program_id(1)
    H = hidden_pad
    Tc = time_chunk
    n_chunks = -(-seq_len // Tc)            # static (Python) chunk count
    r = seq_len - (n_chunks - 1) * Tc       # valid steps in the LAST chunk

    @pl.when(t == 0)
    def _():
        h_scr[...] = jnp.zeros_like(h_scr)
        c_scr[...] = jnp.zeros_like(c_scr)
        out_ref[...] = jnp.zeros_like(out_ref)   # robust to revisit semantics

    tc, tb, d = x_ref.shape
    # Fused input projection for the whole chunk: one big (Tc*tb, Dp) @ (Dp, 4Hp)
    # MXU matmul, independent of h, overlapped with the serial chain below.
    pre = (jnp.dot(x_ref[...].reshape(tc * tb, d), wih_ref[...],
                   preferred_element_type=jnp.float32)
           + b_ref[...]).reshape(tc, tb, 4 * H)

    whh = whh_ref[...]
    h = h_scr[...]
    c = c_scr[...]

    # Static unroll over the chunk: lane-aligned static gate slices, one long
    # straight-line region for the LLO scheduler to overlap MXU/EUP/VPU work.
    for s in range(Tc):
        gates = pre[s] + jnp.dot(h.astype(whh.dtype), whh,
                                 preferred_element_type=jnp.float32)
        # Gates packed as (i, f, o, g): one fused sigmoid over 3*Hp lanes.
        sig = jax.nn.sigmoid(gates[:, 0:3 * H])
        i_g = sig[:, 0 * H:1 * H]
        f_g = sig[:, 1 * H:2 * H]
        o_g = sig[:, 2 * H:3 * H]
        g_g = jnp.tanh(gates[:, 3 * H:4 * H])
        c_new = f_g * c + i_g * g_g
        h_new = o_g * jnp.tanh(c_new)
        if s >= r:
            # Possible zero-padded tail step (only in the last time chunk):
            # keep the previous state with a cheap vselect.
            valid = t < (n_chunks - 1)
            c = jnp.where(valid, c_new, c)
            h = jnp.where(valid, h_new, h)
        else:
            c = c_new
            h = h_new

    h_scr[...] = h
    c_scr[...] = c

    @pl.when(t == pl.num_programs(1) - 1)
    def _():
        out_ref[...] = (jnp.dot(h.astype(wfc_ref.dtype), wfc_ref[...],
                                preferred_element_type=jnp.float32)
                        + bfc_ref[...]).astype(out_ref.dtype)


def lstm_forward(x, params, *, compute_dtype=jnp.bfloat16, max_time_chunk=8):
    """x: (B, T, D) float32 (batch_first, like the PyTorch module). Returns (B, O)."""
    B, T, D = x.shape
    w_ih, w_hh, b_ih, b_hh, w_fc, b_fc = (
        params["w_ih"], params["w_hh"], params["b_ih"], params["b_hh"],
        params["w_fc"], params["b_fc"])
    H = w_hh.shape[1]
    O = w_fc.shape[0]

    Hp = _round_up(H, 128)          # lane-aligned per-gate hidden size
    Op = _round_up(O, 128)          # lane-dense output store
    Dp = _round_up(D, 128)          # lane-dense input features
    Bp = _round_up(B, 8)            # sublane-aligned batch
    H4p = 4 * Hp

    # Fixed time chunk; T is zero-padded and the tail is masked in-kernel.
    Tc = min(T, max_time_chunk)
    n_tc = -(-T // Tc)
    Tp = n_tc * Tc

    # ---------------- batch tiling ----------------
    # Split across TensorCores only on multi-TC chips; a split on single-TC
    # v5e/v6e would just double the number of serial recurrence chains.
    n_cores = _num_tensorcores_per_chip()
    tb = Bp
    if n_cores > 1 and Bp % (8 * n_cores) == 0:
        tb = Bp // n_cores
    # vreg-pressure cap: per-step live set ~ tb * 7*Hp f32; keep it within
    # ~2x the 256 KiB vreg file to avoid spills on the latency-critical chain.
    row_budget = max(8, ((2 * 256 * 1024) // (7 * Hp * 4)) // 8 * 8)
    while tb > row_budget and tb % 16 == 0:
        tb //= 2
    n_bt = Bp // tb

    f32 = jnp.float32
    GATE_PERM = jnp.array([0, 1, 3, 2])   # PyTorch (i,f,g,o) -> packed (i,f,o,g)

    # ---------------- parameter layout glue (plain JAX) ----------------
    def pack_gates(w, in_pad):
        """(4H, K) PyTorch gate-stacked -> (4*Hp, in_pad), reordered + padded."""
        K = w.shape[1]
        w4 = jnp.take(w.reshape(4, H, K), GATE_PERM, axis=0)
        w4 = jnp.pad(w4, ((0, 0), (0, Hp - H), (0, in_pad - K)))
        return w4.reshape(4 * Hp, in_pad)

    wih_t = pack_gates(w_ih, Dp).T.astype(compute_dtype)              # (Dp, 4Hp)
    whh_t = pack_gates(w_hh, Hp).T.astype(compute_dtype)              # (Hp, 4Hp)
    bias = jnp.pad(jnp.take((b_ih + b_hh).reshape(4, H), GATE_PERM, axis=0),
                   ((0, 0), (0, Hp - H))).reshape(1, H4p).astype(f32)  # (1, 4Hp)
    wfc_t = jnp.pad(w_fc, ((0, Op - O), (0, Hp - H))).T.astype(compute_dtype)  # (Hp, Op)
    bfc = jnp.pad(b_fc, (0, Op - O)).reshape(1, Op).astype(f32)        # (1, Op)

    x_tm = jnp.transpose(x, (1, 0, 2))                                 # (T, B, D)
    x_tm = jnp.pad(x_tm, ((0, Tp - T), (0, Bp - B), (0, Dp - D))).astype(compute_dtype)

    # ---------------- explicit VMEM budget ----------------
    # NOTE: for very large H, single-buffering the grid-invariant weight specs
    # (pipeline_mode=pl.Buffered(1)) would halve their VMEM; matters most on
    # v7x's 64 MiB VMEM.  At these footprints double-buffering is fine.
    footprint = (
        2 * _bytes((Tc, tb, Dp), compute_dtype)     # x chunk (double-buffered)
        + 2 * _bytes((Dp, H4p), compute_dtype)      # W_ih^T
        + 2 * _bytes((1, H4p), f32)                 # bias
        + 2 * _bytes((Hp, H4p), compute_dtype)      # W_hh^T
        + 2 * _bytes((Hp, Op), compute_dtype)       # W_fc^T
        + 2 * _bytes((1, Op), f32)                  # b_fc
        + 2 * _bytes((tb, Op), f32)                 # output block
        + 2 * _bytes((tb, Hp), f32)                 # h + c scratch
        + _bytes((Tc, tb, H4p), f32)                # in-kernel `pre` temporary
    )
    phys_vmem = (64 if "v7" in _device_kind() else 128) * (1 << 20)
    vmem_limit = int(min(max(2 * footprint, 16 << 20), phys_vmem - (2 << 20)))

    kernel = functools.partial(_lstm_fused_kernel,
                               hidden_pad=Hp, time_chunk=Tc, seq_len=T)

    out_pad = pl.pallas_call(
        kernel,
        out_shape=jax.ShapeDtypeStruct((Bp, Op), f32),
        grid_spec=pltpu.PrefetchScalarGridSpec(
            num_scalar_prefetch=0,
            grid=(n_bt, n_tc),
            in_specs=[
                pl.BlockSpec((Tc, tb, Dp), lambda b, t: (t, b, 0)),   # x chunk
                pl.BlockSpec((Dp, H4p), lambda b, t: (0, 0)),         # W_ih^T
                pl.BlockSpec((1, H4p), lambda b, t: (0, 0)),          # b_ih + b_hh
                pl.BlockSpec((Hp, H4p), lambda b, t: (0, 0)),         # W_hh^T
                pl.BlockSpec((Hp, Op), lambda b, t: (0, 0)),          # W_fc^T
                pl.BlockSpec((1, Op), lambda b, t: (0, 0)),           # b_fc
            ],
            out_specs=pl.BlockSpec((tb, Op), lambda b, t: (b, 0)),
            scratch_shapes=[
                pltpu.VMEM((tb, Hp), f32),   # h state
                pltpu.VMEM((tb, Hp), f32),   # c state
            ],
        ),
        compiler_params=pltpu.CompilerParams(
            # batch tiles independent; time axis carries h/c -> never "parallel"
            dimension_semantics=("parallel", "arbitrary"),
            vmem_limit_bytes=vmem_limit),
    )(x_tm, wih_t, bias, whh_t, wfc_t, bfc)

    return out_pad[:B, :O]


def init_params(key, input_size, hidden_size, output_size):
    """Deterministic PyTorch-style uniform(-1/sqrt(H), 1/sqrt(H)) init."""
    ks = jax.random.split(key, 6)
    k_lstm = 1.0 / jnp.sqrt(hidden_size)
    k_fc = 1.0 / jnp.sqrt(hidden_size)
    u = lambda k, shape, a: jax.random.uniform(k, shape, jnp.float32, -a, a)
    return {
        "w_ih": u(ks[0], (4 * hidden_size, input_size), k_lstm),
        "w_hh": u(ks[1], (4 * hidden_size, hidden_size), k_lstm),
        "b_ih": u(ks[2], (4 * hidden_size,), k_lstm),
        "b_hh": u(ks[3], (4 * hidden_size,), k_lstm),
        "w_fc": u(ks[4], (output_size, hidden_size), k_fc),
        "b_fc": u(ks[5], (output_size,), k_fc),
    }


def _reference_forward(x, params, compute_dtype=jnp.bfloat16):
    """Pure-JAX reference mirroring the kernel's bf16-operand / f32-accum math."""
    B, T, D = x.shape
    H = params["w_hh"].shape[1]
    cd = compute_dtype
    w_ih = params["w_ih"].astype(cd)
    w_hh = params["w_hh"].astype(cd)
    b = (params["b_ih"] + params["b_hh"]).astype(jnp.float32)
    w_fc = params["w_fc"].astype(cd)
    b_fc = params["b_fc"].astype(jnp.float32)

    def step(carry, x_t):
        h, c = carry
        gates = (jnp.dot(x_t.astype(cd), w_ih.T, preferred_element_type=jnp.float32)
                 + jnp.dot(h.astype(cd), w_hh.T, preferred_element_type=jnp.float32)
                 + b)
        i = jax.nn.sigmoid(gates[:, 0 * H:1 * H])
        f = jax.nn.sigmoid(gates[:, 1 * H:2 * H])
        g = jnp.tanh(gates[:, 2 * H:3 * H])
        o = jax.nn.sigmoid(gates[:, 3 * H:4 * H])
        c = f * c + i * g
        h = o * jnp.tanh(c)
        return (h, c), None

    h0 = jnp.zeros((B, H), jnp.float32)
    c0 = jnp.zeros((B, H), jnp.float32)
    (hn, _), _ = lax.scan(step, (h0, c0), jnp.transpose(x, (1, 0, 2)))
    return jnp.dot(hn.astype(cd), w_fc.T, preferred_element_type=jnp.float32) + b_fc


if __name__ == "__main__":
    key = jax.random.PRNGKey(0)
    batch, seq, input_size, hidden_size, output_size = 4, 8, 16, 32, 8

    k_x, k_p = jax.random.split(key)
    x = jax.random.normal(k_x, (batch, seq, input_size), dtype=jnp.float32)
    params = init_params(k_p, input_size, hidden_size, output_size)

    out = lstm_forward(x, params)
    out = jax.block_until_ready(out)

    ref = _reference_forward(x, params)
    assert out.shape == (batch, output_size)
    assert jnp.allclose(out, ref, atol=5e-3, rtol=5e-3), \
        float(jnp.max(jnp.abs(out - ref)))

    print("KERNEL_OK")
</pallas_src>

<mosaic_0001>
module attributes {stable_mosaic.version = 11 : i64} {
  func.func @_lstm_fused_kernel(%arg0: i32, %arg1: i32, %arg2: memref<8x8x128xbf16, #tpu.memory_space<vmem>>, %arg3: memref<128x512xbf16, #tpu.memory_space<vmem>>, %arg4: memref<1x512xf32, #tpu.memory_space<vmem>>, %arg5: memref<128x512xbf16, #tpu.memory_space<vmem>>, %arg6: memref<128x128xbf16, #tpu.memory_space<vmem>>, %arg7: memref<1x128xf32, #tpu.memory_space<vmem>>, %arg8: memref<8x128xf32, #tpu.memory_space<vmem>>, %arg9: memref<8x128xf32, #tpu.memory_space<vmem>>, %arg10: memref<8x128xf32, #tpu.memory_space<vmem>>) attributes {dimension_semantics = [#tpu.dimension_semantics<parallel>, #tpu.dimension_semantics<arbitrary>], iteration_bounds = array<i64: 1, 1>, scalar_prefetch = 0 : i64, scratch_operands = 2 : i64, tpu.core_type = #tpu.core_type<tc>, window_params = [{transform_indices = @transform_0, window_bounds = array<i64: 8, 8, 128>}, {pipeline_mode = #tpu.pipeline_mode<synchronous>, transform_indices = @transform_1, window_bounds = array<i64: 128, 512>}, {pipeline_mode = #tpu.pipeline_mode<synchronous>, transform_indices = @transform_2, window_bounds = array<i64: 1, 512>}, {pipeline_mode = #tpu.pipeline_mode<synchronous>, transform_indices = @transform_3, window_bounds = array<i64: 128, 512>}, {pipeline_mode = #tpu.pipeline_mode<synchronous>, transform_indices = @transform_4, window_bounds = array<i64: 128, 128>}, {pipeline_mode = #tpu.pipeline_mode<synchronous>, transform_indices = @transform_5, window_bounds = array<i64: 1, 128>}, {transform_indices = @transform_6, window_bounds = array<i64: 8, 128>}]} {
    %c0_i32 = arith.constant 0 : i32
    %0 = arith.cmpi eq, %arg1, %c0_i32 : i32
    %1 = arith.extui %0 : i1 to i32
    %c0_i32_0 = arith.constant 0 : i32
    %2 = arith.cmpi ne, %1, %c0_i32_0 : i32
    scf.if %2 {
      %cst_35 = arith.constant 0.000000e+00 : f32
      %187 = vector.broadcast %cst_35 : f32 to vector<8x128xf32>
      %c0_36 = arith.constant 0 : index
      %c0_37 = arith.constant 0 : index
      %188 = vector.load %arg9[%c0_36, %c0_37] : memref<8x128xf32, #tpu.memory_space<vmem>>, vector<8x128xf32>
      tpu.vector_store %arg9[%c0_36, %c0_37], %187 {strides = array<i32>} : memref<8x128xf32, #tpu.memory_space<vmem>>, vector<8x128xf32>,
      %cst_38 = arith.constant 0.000000e+00 : f32
      %189 = vector.broadcast %cst_38 : f32 to vector<8x128xf32>
      %c0_39 = arith.constant 0 : index
      %c0_40 = arith.constant 0 : index
      %190 = vector.load %arg10[%c0_39, %c0_40] : memref<8x128xf32, #tpu.memory_space<vmem>>, vector<8x128xf32>
      tpu.vector_store %arg10[%c0_39, %c0_40], %189 {strides = array<i32>} : memref<8x128xf32, #tpu.memory_space<vmem>>, vector<8x128xf32>,
      %cst_41 = arith.constant 0.000000e+00 : f32
      %191 = vector.broadcast %cst_41 : f32 to vector<8x128xf32>
      %c0_42 = arith.constant 0 : index
      %c0_43 = arith.constant 0 : index
      %192 = vector.load %arg8[%c0_42, %c0_43] : memref<8x128xf32, #tpu.memory_space<vmem>>, vector<8x128xf32>
      tpu.vector_store %arg8[%c0_42, %c0_43], %191 {strides = array<i32>} : memref<8x128xf32, #tpu.memory_space<vmem>>, vector<8x128xf32>,
    } else {
    }
    %c0 = arith.constant 0 : index
    %c0_1 = arith.constant 0 : index
    %c0_2 = arith.constant 0 : index
    %3 = vector.load %arg2[%c0, %c0_1, %c0_2] : memref<8x8x128xbf16, #tpu.memory_space<vmem>>, vector<8x8x128xbf16>
    %4 = vector.shape_cast %3 : vector<8x8x128xbf16> to vector<64x128xbf16>
    %c0_3 = arith.constant 0 : index
    %c0_4 = arith.constant 0 : index
    %5 = vector.load %arg3[%c0_3, %c0_4] : memref<128x512xbf16, #tpu.memory_space<vmem>>, vector<128x512xbf16>
    %cst = arith.constant dense<0.000000e+00> : vector<64x512xf32>
    %6 = tpu.matmul %4, %5, %cst {dimension_numbers = #tpu.dot_dimension_numbers<[1], [0], [0], [1], [0, 0, 1, 1], [], []>} : vector<64x128xbf16>, vector<128x512xbf16>, vector<64x512xf32> -> vector<64x512xf32>
    %c0_5 = arith.constant 0 : index
    %c0_6 = arith.constant 0 : index
    %7 = vector.load %arg4[%c0_5, %c0_6] : memref<1x512xf32, #tpu.memory_space<vmem>>, vector<1x512xf32>
    %8 = vector.broadcast %7 : vector<1x512xf32> to vector<64x512xf32>
    %9 = arith.addf %6, %8 : vector<64x512xf32>
    %10 = vector.shape_cast %9 : vector<64x512xf32> to vector<8x8x512xf32>
    %c0_7 = arith.constant 0 : index
    %c0_8 = arith.constant 0 : index
    %11 = vector.load %arg5[%c0_7, %c0_8] : memref<128x512xbf16, #tpu.memory_space<vmem>>, vector<128x512xbf16>
    %c0_9 = arith.constant 0 : index
    %c0_10 = arith.constant 0 : index
    %12 = vector.load %arg9[%c0_9, %c0_10] : memref<8x128xf32, #tpu.memory_space<vmem>>, vector<8x128xf32>
    %c0_11 = arith.constant 0 : index
    %c0_12 = arith.constant 0 : index
    %13 = vector.load %arg10[%c0_11, %c0_12] : memref<8x128xf32, #tpu.memory_space<vmem>>, vector<8x128xf32>
    %14 = vector.extract_strided_slice %10 {offsets = [0, 0, 0], sizes = [1, 8, 512], strides = [1, 1, 1]} : vector<8x8x512xf32> to vector<1x8x512xf32>
    %15 = vector.shape_cast %14 : vector<1x8x512xf32> to vector<8x512xf32>
    %16 = arith.truncf %12 : vector<8x128xf32> to vector<8x128xbf16>
    %cst_13 = arith.constant dense<0.000000e+00> : vector<8x512xf32>
    %17 = tpu.matmul %16, %11, %cst_13 {dimension_numbers = #tpu.dot_dimension_numbers<[1], [0], [0], [1], [0, 0, 1, 1], [], []>} : vector<8x128xbf16>, vector<128x512xbf16>, vector<8x512xf32> -> vector<8x512xf32>
    %18 = arith.addf %15, %17 : vector<8x512xf32>
    %19 = vector.extract_strided_slice %18 {offsets = [0, 0], sizes = [8, 384], strides = [1, 1]} : vector<8x512xf32> to vector<8x384xf32>
    %20 = arith.negf %19 : vector<8x384xf32>
    %21 = math.exp %20 : vector<8x384xf32>
    %cst_14 = arith.constant 1.000000e+00 : f32
    %22 = vector.broadcast %cst_14 : f32 to vector<8x384xf32>
    %23 = arith.addf %22, %21 : vector<8x384xf32>
    %24 = arith.divf %22, %23 : vector<8x384xf32>
    %25 = vector.extract_strided_slice %24 {offsets = [0, 0], sizes = [8, 128], strides = [1, 1]} : vector<8x384xf32> to vector<8x128xf32>
    %26 = vector.extract_strided_slice %24 {offsets = [0, 128], sizes = [8, 128], strides = [1, 1]} : vector<8x384xf32> to vector<8x128xf32>
    %27 = vector.extract_strided_slice %24 {offsets = [0, 256], sizes = [8, 128], strides = [1, 1]} : vector<8x384xf32> to vector<8x128xf32>
    %28 = vector.extract_strided_slice %18 {offsets = [0, 384], sizes = [8, 128], strides = [1, 1]} : vector<8x512xf32> to vector<8x128xf32>
    %29 = math.tanh %28 : vector<8x128xf32>
    %30 = arith.mulf %26, %13 : vector<8x128xf32>
    %31 = arith.mulf %25, %29 : vector<8x128xf32>
    %32 = arith.addf %30, %31 : vector<8x128xf32>
    %33 = math.tanh %32 : vector<8x128xf32>
    %34 = arith.mulf %27, %33 : vector<8x128xf32>
    %35 = vector.extract_strided_slice %10 {offsets = [1, 0, 0], sizes = [1, 8, 512], strides = [1, 1, 1]} : vector<8x8x512xf32> to vector<1x8x512xf32>
    %36 = vector.shape_cast %35 : vector<1x8x512xf32> to vector<8x512xf32>
    %37 = arith.truncf %34 : vector<8x128xf32> to vector<8x128xbf16>
    %cst_15 = arith.constant dense<0.000000e+00> : vector<8x512xf32>
    %38 = tpu.matmul %37, %11, %cst_15 {dimension_numbers = #tpu.dot_dimension_numbers<[1], [0], [0], [1], [0, 0, 1, 1], [], []>} : vector<8x128xbf16>, vector<128x512xbf16>, vector<8x512xf32> -> vector<8x512xf32>
    %39 = arith.addf %36, %38 : vector<8x512xf32>
    %40 = vector.extract_strided_slice %39 {offsets = [0, 0], sizes = [8, 384], strides = [1, 1]} : vector<8x512xf32> to vector<8x384xf32>
    %41 = arith.negf %40 : vector<8x384xf32>
    %42 = math.exp %41 : vector<8x384xf32>
    %cst_16 = arith.constant 1.000000e+00 : f32
    %43 = vector.broadcast %cst_16 : f32 to vector<8x384xf32>
    %44 = arith.addf %43, %42 : vector<8x384xf32>
    %45 = arith.divf %43, %44 : vector<8x384xf32>
    %46 = vector.extract_strided_slice %45 {offsets = [0, 0], sizes = [8, 128], strides = [1, 1]} : vector<8x384xf32> to vector<8x128xf32>
    %47 = vector.extract_strided_slice %45 {offsets = [0, 128], sizes = [8, 128], strides = [1, 1]} : vector<8x384xf32> to vector<8x128xf32>
    %48 = vector.extract_strided_slice %45 {offsets = [0, 256], sizes = [8, 128], strides = [1, 1]} : vector<8x384xf32> to vector<8x128xf32>
    %49 = vector.extract_strided_slice %39 {offsets = [0, 384], sizes = [8, 128], strides = [1, 1]} : vector<8x512xf32> to vector<8x128xf32>
    %50 = math.tanh %49 : vector<8x128xf32>
    %51 = arith.mulf %47, %32 : vector<8x128xf32>
    %52 = arith.mulf %46, %50 : vector<8x128xf32>
    %53 = arith.addf %51, %52 : vector<8x128xf32>
    %54 = math.tanh %53 : vector<8x128xf32>
    %55 = arith.mulf %48, %54 : vector<8x128xf32>
    %56 = vector.extract_strided_slice %10 {offsets = [2, 0, 0], sizes = [1, 8, 512], strides = [1, 1, 1]} : vector<8x8x512xf32> to vector<1x8x512xf32>
    %57 = vector.shape_cast %56 : vector<1x8x512xf32> to vector<8x512xf32>
    %58 = arith.truncf %55 : vector<8x128xf32> to vector<8x128xbf16>
    %cst_17 = arith.constant dense<0.000000e+00> : vector<8x512xf32>
    %59 = tpu.matmul %58, %11, %cst_17 {dimension_numbers = #tpu.dot_dimension_numbers<[1], [0], [0], [1], [0, 0, 1, 1], [], []>} : vector<8x128xbf16>, vector<128x512xbf16>, vector<8x512xf32> -> vector<8x512xf32>
    %60 = arith.addf %57, %59 : vector<8x512xf32>
    %61 = vector.extract_strided_slice %60 {offsets = [0, 0], sizes = [8, 384], strides = [1, 1]} : vector<8x512xf32> to vector<8x384xf32>
    %62 = arith.negf %61 : vector<8x384xf32>
    %63 = math.exp %62 : vector<8x384xf32>
    %cst_18 = arith.constant 1.000000e+00 : f32
    %64 = vector.broadcast %cst_18 : f32 to vector<8x384xf32>
    %65 = arith.addf %64, %63 : vector<8x384xf32>
    %66 = arith.divf %64, %65 : vector<8x384xf32>
    %67 = vector.extract_strided_slice %66 {offsets = [0, 0], sizes = [8, 128], strides = [1, 1]} : vector<8x384xf32> to vector<8x128xf32>
    %68 = vector.extract_strided_slice %66 {offsets = [0, 128], sizes = [8, 128], strides = [1, 1]} : vector<8x384xf32> to vector<8x128xf32>
    %69 = vector.extract_strided_slice %66 {offsets = [0, 256], sizes = [8, 128], strides = [1, 1]} : vector<8x384xf32> to vector<8x128xf32>
    %70 = vector.extract_strided_slice %60 {offsets = [0, 384], sizes = [8, 128], strides = [1, 1]} : vector<8x512xf32> to vector<8x128xf32>
    %71 = math.tanh %70 : vector<8x128xf32>
    %72 = arith.mulf %68, %53 : vector<8x128xf32>
    %73 = arith.mulf %67, %71 : vector<8x128xf32>
    %74 = arith.addf %72, %73 : vector<8x128xf32>
    %75 = math.tanh %74 : vector<8x128xf32>
    %76 = arith.mulf %69, %75 : vector<8x128xf32>
    %77 = vector.extract_strided_slice %10 {offsets = [3, 0, 0], sizes = [1, 8, 512], strides = [1, 1, 1]} : vector<8x8x512xf32> to vector<1x8x512xf32>
    %78 = vector.shape_cast %77 : vector<1x8x512xf32> to vector<8x512xf32>
    %79 = arith.truncf %76 : vector<8x128xf32> to vector<8x128xbf16>
    %cst_19 = arith.constant dense<0.000000e+00> : vector<8x512xf32>
    %80 = tpu.matmul %79, %11, %cst_19 {dimension_numbers = #tpu.dot_dimension_numbers<[1], [0], [0], [1], [0, 0, 1, 1], [], []>} : vector<8x128xbf16>, vector<128x512xbf16>, vector<8x512xf32> -> vector<8x512xf32>
    %81 = arith.addf %78, %80 : vector<8x512xf32>
    %82 = vector.extract_strided_slice %81 {offsets = [0, 0], sizes = [8, 384], strides = [1, 1]} : vector<8x512xf32> to vector<8x384xf32>
    %83 = arith.negf %82 : vector<8x384xf32>
    %84 = math.exp %83 : vector<8x384xf32>
    %cst_20 = arith.constant 1.000000e+00 : f32
    %85 = vector.broadcast %cst_20 : f32 to vector<8x384xf32>
    %86 = arith.addf %85, %84 : vector<8x384xf32>
    %87 = arith.divf %85, %86 : vector<8x384xf32>
    %88 = vector.extract_strided_slice %87 {offsets = [0, 0], sizes = [8, 128], strides = [1, 1]} : vector<8x384xf32> to vector<8x128xf32>
    %89 = vector.extract_strided_slice %87 {offsets = [0, 128], sizes = [8, 128], strides = [1, 1]} : vector<8x384xf32> to vector<8x128xf32>
    %90 = vector.extract_strided_slice %87 {offsets = [0, 256], sizes = [8, 128], strides = [1, 1]} : vector<8x384xf32> to vector<8x128xf32>
    %91 = vector.extract_strided_slice %81 {offsets = [0, 384], sizes = [8, 128], strides = [1, 1]} : vector<8x512xf32> to vector<8x128xf32>
    %92 = math.tanh %91 : vector<8x128xf32>
    %93 = arith.mulf %89, %74 : vector<8x128xf32>
    %94 = arith.mulf %88, %92 : vector<8x128xf32>
    %95 = arith.addf %93, %94 : vector<8x128xf32>
    %96 = math.tanh %95 : vector<8x128xf32>
    %97 = arith.mulf %90, %96 : vector<8x128xf32>
    %98 = vector.extract_strided_slice %10 {offsets = [4, 0, 0], sizes = [1, 8, 512], strides = [1, 1, 1]} : vector<8x8x512xf32> to vector<1x8x512xf32>
    %99 = vector.shape_cast %98 : vector<1x8x512xf32> to vector<8x512xf32>
    %100 = arith.truncf %97 : vector<8x128xf32> to vector<8x128xbf16>
    %cst_21 = arith.constant dense<0.000000e+00> : vector<8x512xf32>
    %101 = tpu.matmul %100, %11, %cst_21 {dimension_numbers = #tpu.dot_dimension_numbers<[1], [0], [0], [1], [0, 0, 1, 1], [], []>} : vector<8x128xbf16>, vector<128x512xbf16>, vector<8x512xf32> -> vector<8x512xf32>
    %102 = arith.addf %99, %101 : vector<8x512xf32>
    %103 = vector.extract_strided_slice %102 {offsets = [0, 0], sizes = [8, 384], strides = [1, 1]} : vector<8x512xf32> to vector<8x384xf32>
    %104 = arith.negf %103 : vector<8x384xf32>
    %105 = math.exp %104 : vector<8x384xf32>
    %cst_22 = arith.constant 1.000000e+00 : f32
    %106 = vector.broadcast %cst_22 : f32 to vector<8x384xf32>
    %107 = arith.addf %106, %105 : vector<8x384xf32>
    %108 = arith.divf %106, %107 : vector<8x384xf32>
    %109 = vector.extract_strided_slice %108 {offsets = [0, 0], sizes = [8, 128], strides = [1, 1]} : vector<8x384xf32> to vector<8x128xf32>
    %110 = vector.extract_strided_slice %108 {offsets = [0, 128], sizes = [8, 128], strides = [1, 1]} : vector<8x384xf32> to vector<8x128xf32>
    %111 = vector.extract_strided_slice %108 {offsets = [0, 256], sizes = [8, 128], strides = [1, 1]} : vector<8x384xf32> to vector<8x128xf32>
    %112 = vector.extract_strided_slice %102 {offsets = [0, 384], sizes = [8, 128], strides = [1, 1]} : vector<8x512xf32> to vector<8x128xf32>
    %113 = math.tanh %112 : vector<8x128xf32>
    %114 = arith.mulf %110, %95 : vector<8x128xf32>
    %115 = arith.mulf %109, %113 : vector<8x128xf32>
    %116 = arith.addf %114, %115 : vector<8x128xf32>
    %117 = math.tanh %116 : vector<8x128xf32>
    %118 = arith.mulf %111, %117 : vector<8x128xf32>
    %119 = vector.extract_strided_slice %10 {offsets = [5, 0, 0], sizes = [1, 8, 512], strides = [1, 1, 1]} : vector<8x8x512xf32> to vector<1x8x512xf32>
    %120 = vector.shape_cast %119 : vector<1x8x512xf32> to vector<8x512xf32>
    %121 = arith.truncf %118 : vector<8x128xf32> to vector<8x128xbf16>
    %cst_23 = arith.constant dense<0.000000e+00> : vector<8x512xf32>
    %122 = tpu.matmul %121, %11, %cst_23 {dimension_numbers = #tpu.dot_dimension_numbers<[1], [0], [0], [1], [0, 0, 1, 1], [], []>} : vector<8x128xbf16>, vector<128x512xbf16>, vector<8x512xf32> -> vector<8x512xf32>
    %123 = arith.addf %120, %122 : vector<8x512xf32>
    %124 = vector.extract_strided_slice %123 {offsets = [0, 0], sizes = [8, 384], strides = [1, 1]} : vector<8x512xf32> to vector<8x384xf32>
    %125 = arith.negf %124 : vector<8x384xf32>
    %126 = math.exp %125 : vector<8x384xf32>
    %cst_24 = arith.constant 1.000000e+00 : f32
    %127 = vector.broadcast %cst_24 : f32 to vector<8x384xf32>
    %128 = arith.addf %127, %126 : vector<8x384xf32>
    %129 = arith.divf %127, %128 : vector<8x384xf32>
    %130 = vector.extract_strided_slice %129 {offsets = [0, 0], sizes = [8, 128], strides = [1, 1]} : vector<8x384xf32> to vector<8x128xf32>
    %131 = vector.extract_strided_slice %129 {offsets = [0, 128], sizes = [8, 128], strides = [1, 1]} : vector<8x384xf32> to vector<8x128xf32>
    %132 = vector.extract_strided_slice %129 {offsets = [0, 256], sizes = [8, 128], strides = [1, 1]} : vector<8x384xf32> to vector<8x128xf32>
    %133 = vector.extract_strided_slice %123 {offsets = [0, 384], sizes = [8, 128], strides = [1, 1]} : vector<8x512xf32> to vector<8x128xf32>
    %134 = math.tanh %133 : vector<8x128xf32>
    %135 = arith.mulf %131, %116 : vector<8x128xf32>
    %136 = arith.mulf %130, %134 : vector<8x128xf32>
    %137 = arith.addf %135, %136 : vector<8x128xf32>
    %138 = math.tanh %137 : vector<8x128xf32>
    %139 = arith.mulf %132, %138 : vector<8x128xf32>
    %140 = vector.extract_strided_slice %10 {offsets = [6, 0, 0], sizes = [1, 8, 512], strides = [1, 1, 1]} : vector<8x8x512xf32> to vector<1x8x512xf32>
    %141 = vector.shape_cast %140 : vector<1x8x512xf32> to vector<8x512xf32>
    %142 = arith.truncf %139 : vector<8x128xf32> to vector<8x128xbf16>
    %cst_25 = arith.constant dense<0.000000e+00> : vector<8x512xf32>
    %143 = tpu.matmul %142, %11, %cst_25 {dimension_numbers = #tpu.dot_dimension_numbers<[1], [0], [0], [1], [0, 0, 1, 1], [], []>} : vector<8x128xbf16>, vector<128x512xbf16>, vector<8x512xf32> -> vector<8x512xf32>
    %144 = arith.addf %141, %143 : vector<8x512xf32>
    %145 = vector.extract_strided_slice %144 {offsets = [0, 0], sizes = [8, 384], strides = [1, 1]} : vector<8x512xf32> to vector<8x384xf32>
    %146 = arith.negf %145 : vector<8x384xf32>
    %147 = math.exp %146 : vector<8x384xf32>
    %cst_26 = arith.constant 1.000000e+00 : f32
    %148 = vector.broadcast %cst_26 : f32 to vector<8x384xf32>
    %149 = arith.addf %148, %147 : vector<8x384xf32>
    %150 = arith.divf %148, %149 : vector<8x384xf32>
    %151 = vector.extract_strided_slice %150 {offsets = [0, 0], sizes = [8, 128], strides = [1, 1]} : vector<8x384xf32> to vector<8x128xf32>
    %152 = vector.extract_strided_slice %150 {offsets = [0, 128], sizes = [8, 128], strides = [1, 1]} : vector<8x384xf32> to vector<8x128xf32>
    %153 = vector.extract_strided_slice %150 {offsets = [0, 256], sizes = [8, 128], strides = [1, 1]} : vector<8x384xf32> to vector<8x128xf32>
    %154 = vector.extract_strided_slice %144 {offsets = [0, 384], sizes = [8, 128], strides = [1, 1]} : vector<8x512xf32> to vector<8x128xf32>
    %155 = math.tanh %154 : vector<8x128xf32>
    %156 = arith.mulf %152, %137 : vector<8x128xf32>
    %157 = arith.mulf %151, %155 : vector<8x128xf32>
    %158 = arith.addf %156, %157 : vector<8x128xf32>
    %159 = math.tanh %158 : vector<8x128xf32>
    %160 = arith.mulf %153, %159 : vector<8x128xf32>
    %161 = vector.extract_strided_slice %10 {offsets = [7, 0, 0], sizes = [1, 8, 512], strides = [1, 1, 1]} : vector<8x8x512xf32> to vector<1x8x512xf32>
    %162 = vector.shape_cast %161 : vector<1x8x512xf32> to vector<8x512xf32>
    %163 = arith.truncf %160 : vector<8x128xf32> to vector<8x128xbf16>
    %cst_27 = arith.constant dense<0.000000e+00> : vector<8x512xf32>
    %164 = tpu.matmul %163, %11, %cst_27 {dimension_numbers = #tpu.dot_dimension_numbers<[1], [0], [0], [1], [0, 0, 1, 1], [], []>} : vector<8x128xbf16>, vector<128x512xbf16>, vector<8x512xf32> -> vector<8x512xf32>
    %165 = arith.addf %162, %164 : vector<8x512xf32>
    %166 = vector.extract_strided_slice %165 {offsets = [0, 0], sizes = [8, 384], strides = [1, 1]} : vector<8x512xf32> to vector<8x384xf32>
    %167 = arith.negf %166 : vector<8x384xf32>
    %168 = math.exp %167 : vector<8x384xf32>
    %cst_28 = arith.constant 1.000000e+00 : f32
    %169 = vector.broadcast %cst_28 : f32 to vector<8x384xf32>
    %170 = arith.addf %169, %168 : vector<8x384xf32>
    %171 = arith.divf %169, %170 : vector<8x384xf32>
    %172 = vector.extract_strided_slice %171 {offsets = [0, 0], sizes = [8, 128], strides = [1, 1]} : vector<8x384xf32> to vector<8x128xf32>
    %173 = vector.extract_strided_slice %171 {offsets = [0, 128], sizes = [8, 128], strides = [1, 1]} : vector<8x384xf32> to vector<8x128xf32>
    %174 = vector.extract_strided_slice %171 {offsets = [0, 256], sizes = [8, 128], strides = [1, 1]} : vector<8x384xf32> to vector<8x128xf32>
    %175 = vector.extract_strided_slice %165 {offsets = [0, 384], sizes = [8, 128], strides = [1, 1]} : vector<8x512xf32> to vector<8x128xf32>
    %176 = math.tanh %175 : vector<8x128xf32>
    %177 = arith.mulf %173, %158 : vector<8x128xf32>
    %178 = arith.mulf %172, %176 : vector<8x128xf32>
    %179 = arith.addf %177, %178 : vector<8x128xf32>
    %180 = math.tanh %179 : vector<8x128xf32>
    %181 = arith.mulf %174, %180 : vector<8x128xf32>
    %c0_29 = arith.constant 0 : index
    %c0_30 = arith.constant 0 : index
    %182 = vector.load %arg9[%c0_29, %c0_30] : memref<8x128xf32, #tpu.memory_space<vmem>>, vector<8x128xf32>
    tpu.vector_store %arg9[%c0_29, %c0_30], %181 {strides = array<i32>} : memref<8x128xf32, #tpu.memory_space<vmem>>, vector<8x128xf32>,
    %c0_31 = arith.constant 0 : index
    %c0_32 = arith.constant 0 : index
    %183 = vector.load %arg10[%c0_31, %c0_32] : memref<8x128xf32, #tpu.memory_space<vmem>>, vector<8x128xf32>
    tpu.vector_store %arg10[%c0_31, %c0_32], %179 {strides = array<i32>} : memref<8x128xf32, #tpu.memory_space<vmem>>, vector<8x128xf32>,
    %c0_i32_33 = arith.constant 0 : i32
    %184 = arith.cmpi eq, %arg1, %c0_i32_33 : i32
    %185 = arith.extui %184 : i1 to i32
    %c0_i32_34 = arith.constant 0 : i32
    %186 = arith.cmpi ne, %185, %c0_i32_34 : i32
    scf.if %186 {
      %187 = arith.truncf %181 : vector<8x128xf32> to vector<8x128xbf16>
      %c0_35 = arith.constant 0 : index
      %c0_36 = arith.constant 0 : index
      %188 = vector.load %arg6[%c0_35, %c0_36] : memref<128x128xbf16, #tpu.memory_space<vmem>>, vector<128x128xbf16>
      %cst_37 = arith.constant dense<0.000000e+00> : vector<8x128xf32>
      %189 = tpu.matmul %187, %188, %cst_37 {dimension_numbers = #tpu.dot_dimension_numbers<[1], [0], [0], [1], [0, 0, 1, 1], [], []>} : vector<8x128xbf16>, vector<128x128xbf16>, vector<8x128xf32> -> vector<8x128xf32>
      %c0_38 = arith.constant 0 : index
      %c0_39 = arith.constant 0 : index
      %190 = vector.load %arg7[%c0_38, %c0_39] : memref<1x128xf32, #tpu.memory_space<vmem>>, vector<1x128xf32>
      %191 = vector.broadcast %190 : vector<1x128xf32> to vector<8x128xf32>
      %192 = arith.addf %189, %191 : vector<8x128xf32>
      %c0_40 = arith.constant 0 : index
      %c0_41 = arith.constant 0 : index
      %193 = vector.load %arg8[%c0_40, %c0_41] : memref<8x128xf32, #tpu.memory_space<vmem>>, vector<8x128xf32>
      tpu.vector_store %arg8[%c0_40, %c0_41], %192 {strides = array<i32>} : memref<8x128xf32, #tpu.memory_space<vmem>>, vector<8x128xf32>,
    } else {
    }
    return
  }
  func.func @transform_0(%arg0: i32, %arg1: i32) -> (i32, i32, i32) {
    %c0_i32 = arith.constant 0 : i32
    %c0_i32_0 = arith.constant 0 : i32
    return %arg1, %arg0, %c0_i32 : i32, i32, i32
  }
  func.func @transform_1(%arg0: i32, %arg1: i32) -> (i32, i32) {
    %c0_i32 = arith.constant 0 : i32
    %c0_i32_0 = arith.constant 0 : i32
    %c0_i32_1 = arith.constant 0 : i32
    return %c0_i32, %c0_i32_0 : i32, i32
  }
  func.func @transform_2(%arg0: i32, %arg1: i32) -> (i32, i32) {
    %c0_i32 = arith.constant 0 : i32
    %c0_i32_0 = arith.constant 0 : i32
    %c0_i32_1 = arith.constant 0 : i32
    return %c0_i32, %c0_i32_0 : i32, i32
  }
  func.func @transform_3(%arg0: i32, %arg1: i32) -> (i32, i32) {
    %c0_i32 = arith.constant 0 : i32
    %c0_i32_0 = arith.constant 0 : i32
    %c0_i32_1 = arith.constant 0 : i32
    return %c0_i32, %c0_i32_0 : i32, i32
  }
  func.func @transform_4(%arg0: i32, %arg1: i32) -> (i32, i32) {
    %c0_i32 = arith.constant 0 : i32
    %c0_i32_0 = arith.constant 0 : i32
    %c0_i32_1 = arith.constant 0 : i32
    return %c0_i32, %c0_i32_0 : i32, i32
  }
  func.func @transform_5(%arg0: i32, %arg1: i32) -> (i32, i32) {
    %c0_i32 = arith.constant 0 : i32
    %c0_i32_0 = arith.constant 0 : i32
    %c0_i32_1 = arith.constant 0 : i32
    return %c0_i32, %c0_i32_0 : i32, i32
  }
  func.func @transform_6(%arg0: i32, %arg1: i32) -> (i32, i32) {
    %c0_i32 = arith.constant 0 : i32
    %c0_i32_0 = arith.constant 0 : i32
    return %arg0, %c0_i32 : i32, i32
  }
}

</mosaic_0001>

<bundles_post_ra>
// kernel: tpu_custom_call.1
= control target key start
LH: loop header
LB: loop body
LE: loop exit
PB: predicated region body
PF: predicated region fallthrough
CT: control target
= control target key end

     0   :  { %11 = vsyncpa [#allocation5], 0  ;;  %s2874_s0 = inlined_call_operand.hbm [shape: bf16[8,8,128], index: 0, kind: input, shape index: {}]   ;;  %s2875_s1 = inlined_call_operand.hbm [shape: bf16[128,512], index: 1, kind: input, shape index: {}]   ;;  %s2876_s2 = inlined_call_operand.vmem [shape: f32[1,512], index: 2, kind: input, shape index: {}]   ;;  %s2877_s3 = inlined_call_operand.hbm [shape: bf16[128,512], index: 3, kind: input, shape index: {}]   ;;  %s2878_s4 = inlined_call_operand.hbm [shape: bf16[128,128], index: 4, kind: input, shape index: {}]   ;;  %s2879_s5 = inlined_call_operand.vmem [shape: f32[1,128], index: 5, kind: input, shape index: {}]   ;;  %s2880_s6 = inlined_call_operand.hbm [shape: f32[8,128], index: 6, kind: output, shape index: {}]  }
   0x1   :  { %12 = vsyncpa [#allocation8], 0 }
   0x2   :  { %13 = vsyncpa [#allocation11], 0 }
   0x3   :  { %14 = vsyncpa [#allocation6], 0  ;;  %s2225_s21 = smov [#allocation7]   ;;  %s2107_s25 = scalar_lea.hbm %s2875_s1, 4096 }
   0x4   :  { %s32_s22 = sshll.u32 %s2225_s21, 4  ;;  %p2108_p0 = scmp.ne.s32.totalorder %s2875_s1, %s2107_s25  ;;  %s33_s22 = int_to_ptr.vmem [resolvable:$true] %s32_s22 }
   0x5   :  { %p2111_p1 = scmp.lt.u32.totalorder %s2107_s25, %s2875_s1 }
   0x7   :  { %p2113_p2 = pnand %p2111_p1, %p2108_p0 }
   0x9   :  { %2116 = shalt.err (!%p2113_p2)
}
   0xa   :  { %s2117_s30 = scalar_lea.vmem %s33_s22, 4096  ;;  %p2122_p4 = scmp.lt.s32.totalorder %s33_s22, %s33_s22 }
   0xb   :  { %p2118_p3 = scmp.ne.s32.totalorder %s33_s22, %s2117_s30  ;;  %p2123_p5 = scmp.lt.s32.totalorder %s2117_s30, %s2117_s30 }
   0xd   :  { %p2124_p6 = por %p2123_p5, %p2122_p4 }
   0xf   :  { %p2125_p7 = pnand %p2124_p6, %p2118_p3 }
  0x11   :  { %2128 = shalt.err (!%p2125_p7)
}
  0x12   :  { %s2226_s7 = smov 256   ;;  %s2227_s8 = smov 16  }
  0x13   :  { %38 = dma.hbm_to_vmem [thread:$0]  %s2875_s1, 4096, %s33_s22, [#allocation8], %s2226_s7, %s2226_s7, %s2227_s8  }
  0x14   :  { %s2228_s11 = smov [#allocation4]   ;;  %s2129_s15 = scalar_lea.hbm %s2874_s0, 512 }
  0x15   :  { %s20_s12 = sshll.u32 %s2228_s11, 4  ;;  %p2130_p8 = scmp.ne.s32.totalorder %s2874_s0, %s2129_s15  ;;  %s21_s12 = int_to_ptr.vmem [resolvable:$true] %s20_s12 }
  0x16   :  { %p2133_p9 = scmp.lt.u32.totalorder %s2129_s15, %s2874_s0 }
  0x18   :  { %p2135_p10 = pnand %p2133_p9, %p2130_p8 }
  0x1a   :  { %2138 = shalt.err (!%p2135_p10)
}
  0x1b   :  { %s2139_s20 = scalar_lea.vmem %s21_s12, 512  ;;  %p2144_p12 = scmp.lt.s32.totalorder %s21_s12, %s21_s12 }
  0x1c   :  { %p2140_p11 = scmp.ne.s32.totalorder %s21_s12, %s2139_s20  ;;  %p2145_p13 = scmp.lt.s32.totalorder %s2139_s20, %s2139_s20 }
  0x1e   :  { %p2146_p0 = por %p2145_p13, %p2144_p12 }
  0x20   :  { %p2147_p1 = pnand %p2146_p0, %p2140_p11 }
  0x22   :  { %2150 = shalt.err (!%p2147_p1)
}
  0x23   :  { %s2229_s1 = smov 64   ;;  %s2230_s21 = smov 4  }
  0x24   :  { %26 = dma.hbm_to_vmem [thread:$0]  %s2874_s0, 512, %s21_s12, [#allocation5], %s2229_s1, %s2229_s1, %s2230_s21  }
  0x25   :  { %s2231_s24 = smov [#allocation9]   ;;  %s2232_s26 = smov [#allocation10]  }
  0x26   :  { %s46_s25 = sshll.u32 %s2231_s24, 4  ;;  %s58_s27 = sshll.u32 %s2232_s26, 4  ;;  %s47_s25 = int_to_ptr.vmem [resolvable:$true] %s46_s25  ;;  %s2303_s27 = int_to_ptr.vmem [resolvable:$true] %s58_s27 }
  0x27   :  { %s2151_s30 = scalar_lea.hbm %s2877_s3, 4096 }
  0x28   :  { %p2152_p2 = scmp.ne.s32.totalorder %s2877_s3, %s2151_s30  ;;  %p2155_p3 = scmp.lt.u32.totalorder %s2151_s30, %s2877_s3 }
  0x2a   :  { %p2157_p4 = pnand %p2155_p3, %p2152_p2 }
  0x2c   :  { %2160 = shalt.err (!%p2157_p4)
}
  0x2d   :  { %s2161_s0 = scalar_lea.vmem %s47_s25, 4096  ;;  %p2166_p6 = scmp.lt.s32.totalorder %s47_s25, %s47_s25 }
  0x2e   :  { %p2162_p5 = scmp.ne.s32.totalorder %s47_s25, %s2161_s0  ;;  %p2167_p7 = scmp.lt.s32.totalorder %s2161_s0, %s2161_s0 }
  0x30   :  { %p2168_p8 = por %p2167_p7, %p2166_p6 }
  0x32   :  { %p2169_p9 = pnand %p2168_p8, %p2162_p5 }
  0x34   :  { %2172 = shalt.err (!%p2169_p9)
}
  0x35   :  { %52 = dma.hbm_to_vmem [thread:$0]  %s2877_s3, 4096, %s47_s25, [#allocation8], %s2226_s7, %s2226_s7, %s2227_s8  }
  0x36   :  { %s2173_s17 = scalar_lea.hbm %s2878_s4, 1024 }
  0x37   :  { %p2174_p10 = scmp.ne.s32.totalorder %s2878_s4, %s2173_s17  ;;  %p2177_p11 = scmp.lt.u32.totalorder %s2173_s17, %s2878_s4 }
  0x39   :  { %p2179_p12 = pnand %p2177_p11, %p2174_p10 }
  0x3b   :  { %2182 = shalt.err (!%p2179_p12)
}
  0x3c   :  { %s2183_s23 = scalar_lea.vmem %s2303_s27, 1024  ;;  %p2188_p0 = scmp.lt.s32.totalorder %s2303_s27, %s2303_s27 }
  0x3d   :  { %p2184_p13 = scmp.ne.s32.totalorder %s2303_s27, %s2183_s23  ;;  %p2189_p1 = scmp.lt.s32.totalorder %s2183_s23, %s2183_s23 }
  0x3f   :  { %p2190_p2 = por %p2189_p1, %p2188_p0 }
  0x41   :  { %p2191_p3 = pnand %p2190_p2, %p2184_p13 }
  0x43   :  { %2194 = shalt.err (!%p2191_p3)
}
  0x44   :  { %64 = dma.hbm_to_vmem [thread:$0]  %s2878_s4, 1024, %s2303_s27, [#allocation11], %s2229_s1, %s2229_s1, %s2230_s21  }
  0x45   :  { %2217 = dma.done.wait [#allocation5], 512  }
  0x46   :  { %2218 = vsyncadd [#allocation5], 4294966784 }
  0x47   :  { %2219 = dma.done.wait [#allocation8], 8192  }
  0x48   :  { %2220 = vsyncadd [#allocation8], 4294959104 }
  0x49   :  { %2221 = dma.done.wait [#allocation11], 1024  }
  0x4a   :  { %2222 = vsyncadd [#allocation11], 4294966272  ;;  %v2881_v0 = vmov 0   ;;  %v1839_v1 = vld [vmem:[#allocation7 + $0x4] ss:$16 sps:$4 sm:$0xff]   ;;  %v1900_v44 = vld [vmem:[#allocation4 + $0x8] sm:$0xff]  }
  0x4b   :  { %365 = vmatprep.mubr.bf16.mxu0 %v2881_v0  ;;  %438 = vmatprep.mubr.bf16.mxu1 %v2881_v0  ;;  %v1841_v2 = vld [vmem:[#allocation7 + $0xc] ss:$16 sps:$4 sm:$0xff]   ;;  %v1843_v3 = vld [vmem:[#allocation7] ss:$16 sps:$4 sm:$0xff]   ;;  %v1844_v4 = vld [vmem:[#allocation7 + $0x8] ss:$16 sps:$4 sm:$0xff]  }
  0x4c   :  { %333 = vmatprep.subr.bf16.mxu0 %v1839_v1  ;;  %406 = vmatprep.subr.bf16.mxu1 %v1841_v2  ;;  %v1845_v5 = vld [vmem:[#allocation7 + $0x24] ss:$16 sps:$4 sm:$0xff]   ;;  %v1847_v6 = vld [vmem:[#allocation7 + $0x2c] ss:$16 sps:$4 sm:$0xff]   ;;  %v1849_v7 = vld [vmem:[#allocation7 + $0x20] ss:$16 sps:$4 sm:$0xff]  }
  0x4d   :  { %334 = vmatpush1.bf16.msra.mxu0 %v1843_v3  ;;  %407 = vmatpush1.bf16.msra.mxu1 %v1844_v4  ;;  %v1850_v8 = vld [vmem:[#allocation7 + $0x28] ss:$16 sps:$4 sm:$0xff]   ;;  %v1851_v9 = vld [vmem:[#allocation7 + $0x44] ss:$16 sps:$4 sm:$0xff]   ;;  %v1853_v10 = vld [vmem:[#allocation7 + $0x4c] ss:$16 sps:$4 sm:$0xff]  }
  0x4e   :  { %335 = vmatprep.subr.bf16.mxu0 %v1845_v5  ;;  %408 = vmatprep.subr.bf16.mxu1 %v1847_v6  ;;  %v1855_v11 = vld [vmem:[#allocation7 + $0x40] ss:$16 sps:$4 sm:$0xff]   ;;  %v1856_v12 = vld [vmem:[#allocation7 + $0x48] ss:$16 sps:$4 sm:$0xff]   ;;  %v1857_v13 = vld [vmem:[#allocation7 + $0x64] ss:$16 sps:$4 sm:$0xff]  }
  0x4f   :  { %v1859_v14 = vld [vmem:[#allocation7 + $0x6c] ss:$16 sps:$4 sm:$0xff]   ;;  %v1861_v15 = vld [vmem:[#allocation7 + $0x60] ss:$16 sps:$4 sm:$0xff]   ;;  %v1862_v16 = vld [vmem:[#allocation7 + $0x68] ss:$16 sps:$4 sm:$0xff]  }
  0x50   :  { %v1863_v17 = vld [vmem:[#allocation7 + $0x84] ss:$16 sps:$4 sm:$0xff]   ;;  %v1865_v18 = vld [vmem:[#allocation7 + $0x8c] ss:$16 sps:$4 sm:$0xff]   ;;  %v1867_v19 = vld [vmem:[#allocation7 + $0x80] ss:$16 sps:$4 sm:$0xff]  }
  0x51   :  { %336 = vmatpush1.bf16.msra.mxu0 %v1849_v7  ;;  %409 = vmatpush1.bf16.msra.mxu1 %v1850_v8  ;;  %v1868_v20 = vld [vmem:[#allocation7 + $0x88] ss:$16 sps:$4 sm:$0xff]   ;;  %v1869_v21 = vld [vmem:[#allocation7 + $0xa4] ss:$16 sps:$4 sm:$0xff]   ;;  %v1871_v22 = vld [vmem:[#allocation7 + $0xac] ss:$16 sps:$4 sm:$0xff]   ;;  %v129_v7 = vlaneseq }
  0x52   :  { %337 = vmatprep.subr.bf16.mxu0 %v1851_v9  ;;  %410 = vmatprep.subr.bf16.mxu1 %v1853_v10  ;;  %v1873_v23 = vld [vmem:[#allocation7 + $0xa0] ss:$16 sps:$4 sm:$0xff]   ;;  %v1874_v24 = vld [vmem:[#allocation7 + $0xa8] ss:$16 sps:$4 sm:$0xff]   ;;  %v1875_v25 = vld [vmem:[#allocation7 + $0xc4] ss:$16 sps:$4 sm:$0xff]  }
  0x53   :  { %v1877_v26 = vld [vmem:[#allocation7 + $0xcc] ss:$16 sps:$4 sm:$0xff]   ;;  %v1879_v27 = vld [vmem:[#allocation7 + $0xc0] ss:$16 sps:$4 sm:$0xff]   ;;  %v1880_v28 = vld [vmem:[#allocation7 + $0xc8] ss:$16 sps:$4 sm:$0xff]  }
  0x54   :  { %v1881_v29 = vld [vmem:[#allocation7 + $0xe4] ss:$16 sps:$4 sm:$0xff]   ;;  %v1883_v30 = vld [vmem:[#allocation7 + $0xec] ss:$16 sps:$4 sm:$0xff]   ;;  %v1885_v31 = vld [vmem:[#allocation7 + $0xe0] ss:$16 sps:$4 sm:$0xff]  }
  0x55   :  { %338 = vmatpush1.bf16.msra.mxu0 %v1855_v11  ;;  %411 = vmatpush1.bf16.msra.mxu1 %v1856_v12  ;;  %v1886_v32 = vld [vmem:[#allocation7 + $0xe8] ss:$16 sps:$4 sm:$0xff]   ;;  %v2342_v33 = vld [vmem:[#allocation9 + $0x4] ss:$16 sps:$4 sm:$0xff]   ;;  %v2344_v34 = vld [vmem:[#allocation9 + $0xc] ss:$16 sps:$4 sm:$0xff]  }
  0x56   :  { %339 = vmatprep.subr.bf16.mxu0 %v1857_v13  ;;  %412 = vmatprep.subr.bf16.mxu1 %v1859_v14  ;;  %v1887_v35 = vld [vmem:[#allocation4] sm:$0xff]   ;;  %v2348_v37 = vld [vmem:[#allocation9 + $0x8] ss:$16 sps:$4 sm:$0xff]   ;;  %v2354_v39 = vld [vmem:[#allocation9 + $0x2c] ss:$16 sps:$4 sm:$0xff]   ;;  %v2234_v6 = vmov 0.0|0.0  }
  0x57   :  { %v2346_v36 = vld [vmem:[#allocation9] ss:$16 sps:$4 sm:$0xff]   ;;  %v2352_v38 = vld [vmem:[#allocation9 + $0x24] ss:$16 sps:$4 sm:$0xff]   ;;  %v2360_v41 = vld [vmem:[#allocation9 + $0x28] ss:$16 sps:$4 sm:$0xff]  }
  0x58   :  { %v2356_v40 = vld [vmem:[#allocation9 + $0x20] ss:$16 sps:$4 sm:$0xff]   ;;  %v2364_v42 = vld [vmem:[#allocation9 + $0x44] ss:$16 sps:$4 sm:$0xff]   ;;  %v2366_v43 = vld [vmem:[#allocation9 + $0x4c] ss:$16 sps:$4 sm:$0xff]  }
  0x59   :  { %340 = vmatpush1.bf16.msra.mxu0 %v1861_v15  ;;  %413 = vmatpush1.bf16.msra.mxu1 %v1862_v16  ;;  %v2370_v45 = vld [vmem:[#allocation9 + $0x40] ss:$16 sps:$4 sm:$0xff]   ;;  %v2372_v46 = vld [vmem:[#allocation9 + $0x48] ss:$16 sps:$4 sm:$0xff]   ;;  %v2376_v47 = vld [vmem:[#allocation9 + $0x64] ss:$16 sps:$4 sm:$0xff]  }
  0x5a   :  { %341 = vmatprep.subr.bf16.mxu0 %v1863_v17  ;;  %414 = vmatprep.subr.bf16.mxu1 %v1865_v18  ;;  %v2380_v48 = vld [vmem:[#allocation9 + $0x6c] ss:$16 sps:$4 sm:$0xff]   ;;  %v2382_v49 = vld [vmem:[#allocation9 + $0x60] ss:$16 sps:$4 sm:$0xff]   ;;  %v2384_v50 = vld [vmem:[#allocation9 + $0x68] ss:$16 sps:$4 sm:$0xff]  }
  0x5b   :  { %v2388_v51 = vld [vmem:[#allocation9 + $0x84] ss:$16 sps:$4 sm:$0xff]   ;;  %v2392_v52 = vld [vmem:[#allocation9 + $0x8c] ss:$16 sps:$4 sm:$0xff]   ;;  %v2396_v54 = vld [vmem:[#allocation9 + $0x80] ss:$16 sps:$4 sm:$0xff]  }
  0x5c   :  { %v1913_v53 = vld [vmem:[#allocation4 + $0x10] sm:$0xff]   ;;  %v2398_v55 = vld [vmem:[#allocation9 + $0x88] ss:$16 sps:$4 sm:$0xff]   ;;  %v2402_v57 = vld [vmem:[#allocation9 + $0xac] ss:$16 sps:$4 sm:$0xff]   ;;  %v130_v8 = vshrl.u32 %v129_v7, 7 }
  0x5d   :  { %342 = vmatpush1.bf16.msra.mxu0 %v1867_v19  ;;  %415 = vmatpush1.bf16.msra.mxu1 %v1868_v20  ;;  %v2400_v56 = vld [vmem:[#allocation9 + $0xa4] ss:$16 sps:$4 sm:$0xff]   ;;  %v2410_v58 = vld [vmem:[#allocation9 + $0xa0] ss:$16 sps:$4 sm:$0xff]   ;;  %v2412_v59 = vld [vmem:[#allocation9 + $0xa8] ss:$16 sps:$4 sm:$0xff]  }
  0x5e   :  { %343 = vmatprep.subr.bf16.mxu0 %v1869_v21  ;;  %416 = vmatprep.subr.bf16.mxu1 %v1871_v22  ;;  %v2416_v60 = vld [vmem:[#allocation9 + $0xc4] ss:$16 sps:$4 sm:$0xff]   ;;  %v2418_v61 = vld [vmem:[#allocation9 + $0xcc] ss:$16 sps:$4 sm:$0xff]   ;;  %v2424_v63 = vld [vmem:[#allocation9 + $0xc0] ss:$16 sps:$4 sm:$0xff]  }
  0x5f   :  { %v1926_v62 = vld [vmem:[#allocation4 + $0x18] sm:$0xff]   ;;  %v2430_v2 = vld [vmem:[#allocation9 + $0xe4] ss:$16 sps:$4 sm:$0xff]   ;;  %v2436_v4 = vld [vmem:[#allocation9 + $0xe0] ss:$16 sps:$4 sm:$0xff]   ;;  %v139_v9 = vsub.s32 2, %v130_v8 }
  0x60   :  { %v2426_v1 = vld [vmem:[#allocation9 + $0xc8] ss:$16 sps:$4 sm:$0xff]   ;;  %v2432_v3 = vld [vmem:[#allocation9 + $0xec] ss:$16 sps:$4 sm:$0xff]   ;;  %v143_v10 = vsub.s32 3, %v130_v8  ;;  %v131_v11 = vsub.s32 0, %v130_v8 }
  0x61   :  { %344 = vmatpush1.bf16.msra.mxu0 %v1873_v23  ;;  %417 = vmatpush1.bf16.msra.mxu1 %v1874_v24  ;;  %v2438_v5 = vld [vmem:[#allocation9 + $0xe8] ss:$16 sps:$4 sm:$0xff]   ;;  %v127_v12 = vld [vmem:[%s2876_s2] sm:$0xf]  ;;  %v135_v13 = vsub.s32 1, %v130_v8  ;;  %vm2236_vm0 = vmmov 0  }
  0x62   :  { %345 = vmatprep.subr.bf16.mxu0 %v1875_v25  ;;  %418 = vmatprep.subr.bf16.mxu1 %v1877_v26  ;;  %v2485_v14 = vrot.slane %v127_v12, %v139_v9  ;;  %v2491_v17 = vrot.slane %v127_v12, %v143_v10  ;;  %v132_v18 = vrot.slane %v127_v12, %v131_v11  ;;  %s2237_s21 = smov [#allocation12]  }
  0x63   :  { %v136_v21 = vrot.slane %v127_v12, %v135_v13  ;;  %s1685_s24 = sshll.u32 %s2237_s21, 4  ;;  %s1686_s24 = int_to_ptr.vmem [resolvable:$true] %s1685_s24 }
  0x64   :  { %s2195_s25 = scalar_lea.vmem %s1686_s24, 128  ;;  %p2200_p5 = scmp.lt.s32.totalorder %s1686_s24, %s1686_s24 }
  0x65   :  { %346 = vmatpush1.bf16.msra.mxu0 %v1879_v27  ;;  %419 = vmatpush1.bf16.msra.mxu1 %v1880_v28  ;;  %p2196_p4 = scmp.ne.s32.totalorder %s1686_s24, %s2195_s25  ;;  %p2201_p6 = scmp.lt.s32.totalorder %s2195_s25, %s2195_s25 }
  0x66   :  { %347 = vmatprep.subr.bf16.mxu0 %v1881_v29  ;;  %420 = vmatprep.subr.bf16.mxu1 %v1883_v30 }
  0x67   :  { %p2202_p7 = por %p2201_p6, %p2200_p5 }
  0x69   :  { %348 = vmatpush1.bf16.msra.mxu0 %v1885_v31  ;;  %421 = vmatpush1.bf16.msra.mxu1 %v1886_v32  ;;  %p2203_p8 = pnand %p2202_p7, %p2196_p4 }
  0x6a   :  { %674 = vmatprep.subr.bf16.mxu0 %v2342_v33  ;;  %715 = vmatprep.subr.bf16.mxu1 %v2344_v34 }
  0x6c   :  { %366 = vmatmul.mubr.bf16.vlgmr.msra.gmra.mrb[0].mxu0 %v1887_v35  ;;  %439 = vmatmul.mubr.bf16.vlgmr.msra.gmra.mrb[0].mxu1 %v1887_v35 }
  0x6d   :  { %675 = vmatpush1.bf16.msra.mxu0 %v2346_v36  ;;  %716 = vmatpush1.bf16.msra.mxu1 %v2348_v37 }
  0x6e   :  { %676 = vmatprep.subr.bf16.mxu0 %v2352_v38  ;;  %717 = vmatprep.subr.bf16.mxu1 %v2354_v39 }
  0x6f   :  { %375 = vmatprep.mubr.bf16.mxu0 %v2881_v0  ;;  %448 = vmatprep.mubr.bf16.mxu1 %v2881_v0 }
  0x71   :  { %677 = vmatpush1.bf16.msra.mxu0 %v2356_v40  ;;  %718 = vmatpush1.bf16.msra.mxu1 %v2360_v41 }
  0x72   :  { %678 = vmatprep.subr.bf16.mxu0 %v2364_v42  ;;  %719 = vmatprep.subr.bf16.mxu1 %v2366_v43 }
  0x74   :  { %376 = vmatmul.mubr.bf16.gmra.mrb[4].mxu0 %v1900_v44  ;;  %449 = vmatmul.mubr.bf16.gmra.mrb[4].mxu1 %v1900_v44 }
  0x75   :  { %679 = vmatpush1.bf16.msra.mxu0 %v2370_v45  ;;  %720 = vmatpush1.bf16.msra.mxu1 %v2372_v46 }
  0x76   :  { %680 = vmatprep.subr.bf16.mxu0 %v2376_v47  ;;  %721 = vmatprep.subr.bf16.mxu1 %v2380_v48 }
  0x77   :  { %385 = vmatprep.mubr.bf16.mxu0 %v2881_v0  ;;  %458 = vmatprep.mubr.bf16.mxu1 %v2881_v0 }
  0x79   :  { %681 = vmatpush1.bf16.msra.mxu0 %v2382_v49  ;;  %722 = vmatpush1.bf16.msra.mxu1 %v2384_v50 }
  0x7a   :  { %682 = vmatprep.subr.bf16.mxu0 %v2388_v51  ;;  %723 = vmatprep.subr.bf16.mxu1 %v2392_v52 }
  0x7c   :  { %386 = vmatmul.mubr.bf16.gmra.mrb[8].mxu0 %v1913_v53  ;;  %459 = vmatmul.mubr.bf16.gmra.mrb[8].mxu1 %v1913_v53 }
  0x7d   :  { %683 = vmatpush1.bf16.msra.mxu0 %v2396_v54  ;;  %724 = vmatpush1.bf16.msra.mxu1 %v2398_v55 }
  0x7e   :  { %684 = vmatprep.subr.bf16.mxu0 %v2400_v56  ;;  %725 = vmatprep.subr.bf16.mxu1 %v2402_v57 }
  0x7f   :  { %395 = vmatprep.mubr.bf16.mxu0 %v2881_v0  ;;  %468 = vmatprep.mubr.bf16.mxu1 %v2881_v0 }
  0x81   :  { %685 = vmatpush1.bf16.msra.mxu0 %v2410_v58  ;;  %726 = vmatpush1.bf16.msra.mxu1 %v2412_v59 }
  0x82   :  { %686 = vmatprep.subr.bf16.mxu0 %v2416_v60  ;;  %727 = vmatprep.subr.bf16.mxu1 %v2418_v61 }
  0x84   :  { %396 = vmatmul.mubr.bf16.gmra.mrb[12].mxu0 %v1926_v62  ;;  %469 = vmatmul.mubr.bf16.gmra.mrb[12].mxu1 %v1926_v62 }
  0x85   :  { %687 = vmatpush1.bf16.msra.mxu0 %v2424_v63  ;;  %728 = vmatpush1.bf16.msra.mxu1 %v2426_v1 }
  0x86   :  { %688 = vmatprep.subr.bf16.mxu0 %v2430_v2  ;;  %729 = vmatprep.subr.bf16.mxu1 %v2432_v3 }
  0x87   :  { %706 = vmatprep.mubr.bf16.mxu0 %v2881_v0  ;;  %747 = vmatprep.mubr.bf16.mxu1 %v2881_v0 }
  0x89   :  { %689 = vmatpush1.bf16.msra.mxu0 %v2436_v4  ;;  %730 = vmatpush1.bf16.msra.mxu1 %v2438_v5 }
  0x8a   :  { %785 = vmatprep.subr.bf16.mxu0 %v2342_v33  ;;  %826 = vmatprep.subr.bf16.mxu1 %v2344_v34 }
  0x8c   :  { %707 = vmatmul.mubr.bf16.vlgmr.msra.gmra.mrb[16].mxu0 %v2234_v6  ;;  %748 = vmatmul.mubr.bf16.vlgmr.msra.gmra.mrb[16].mxu1 %v2234_v6 }
  0x8d   :  { %786 = vmatpush1.bf16.msra.mxu0 %v2346_v36  ;;  %827 = vmatpush1.bf16.msra.mxu1 %v2348_v37 }
  0x8e   :  { %787 = vmatprep.subr.bf16.mxu0 %v2352_v38  ;;  %828 = vmatprep.subr.bf16.mxu1 %v2354_v39 }
  0x8f   :  { %817 = vmatprep.mubr.bf16.mxu0 %v2881_v0  ;;  %858 = vmatprep.mubr.bf16.mxu1 %v2881_v0 }
  0x91   :  { %788 = vmatpush1.bf16.msra.mxu0 %v2356_v40  ;;  %829 = vmatpush1.bf16.msra.mxu1 %v2360_v41 }
  0x92   :  { %789 = vmatprep.subr.bf16.mxu0 %v2364_v42  ;;  %830 = vmatprep.subr.bf16.mxu1 %v2366_v43 }
  0x95   :  { %790 = vmatpush1.bf16.msra.mxu0 %v2370_v45  ;;  %831 = vmatpush1.bf16.msra.mxu1 %v2372_v46 }
  0x96   :  { %791 = vmatprep.subr.bf16.mxu0 %v2376_v47  ;;  %832 = vmatprep.subr.bf16.mxu1 %v2380_v48 }
  0x99   :  { %792 = vmatpush1.bf16.msra.mxu0 %v2382_v49  ;;  %833 = vmatpush1.bf16.msra.mxu1 %v2384_v50 }
  0x9a   :  { %793 = vmatprep.subr.bf16.mxu0 %v2388_v51  ;;  %834 = vmatprep.subr.bf16.mxu1 %v2392_v52 }
  0x9d   :  { %794 = vmatpush1.bf16.msra.mxu0 %v2396_v54  ;;  %835 = vmatpush1.bf16.msra.mxu1 %v2398_v55 }
  0x9e   :  { %795 = vmatprep.subr.bf16.mxu0 %v2400_v56  ;;  %836 = vmatprep.subr.bf16.mxu1 %v2402_v57 }
  0xa1   :  { %796 = vmatpush1.bf16.msra.mxu0 %v2410_v58  ;;  %837 = vmatpush1.bf16.msra.mxu1 %v2412_v59 }
  0xa2   :  { %797 = vmatprep.subr.bf16.mxu0 %v2416_v60  ;;  %838 = vmatprep.subr.bf16.mxu1 %v2418_v61 }
  0xa5   :  { %798 = vmatpush1.bf16.msra.mxu0 %v2424_v63  ;;  %839 = vmatpush1.bf16.msra.mxu1 %v2426_v1 }
  0xa6   :  { %799 = vmatprep.subr.bf16.mxu0 %v2430_v2  ;;  %840 = vmatprep.subr.bf16.mxu1 %v2432_v3 }
  0xa9   :  { %800 = vmatpush1.bf16.msra.mxu0 %v2436_v4  ;;  %841 = vmatpush1.bf16.msra.mxu1 %v2438_v5 }
  0xaa   :  { %896 = vmatprep.subr.bf16.mxu0 %v2342_v33  ;;  %937 = vmatprep.subr.bf16.mxu1 %v2344_v34 }
 0x13f   :  { %v2487_v15 = vpop.f32.mrb[0].mxu0  ;;  %v2489_v16 = vpop.f32.mrb[0].mxu1 }
 0x140   :  { %v369_v19 = vpop.f32.mrb[1].mxu0  ;;  %v442_v20 = vpop.f32.mrb[1].mxu1 }
 0x141   :  { %v371_v22 = vpop.f32.mrb[2].mxu0  ;;  %v444_v23 = vpop.f32.mrb[2].mxu1 }
 0x142   :  { %v2493_v24 = vadd.f32 %v371_v22, %v132_v18  ;;  %v373_v25 = vpop.f32.mrb[3].mxu0  ;;  %v2496_v26 = vadd.f32 %v444_v23, %v2485_v14  ;;  %v446_v27 = vpop.f32.mrb[3].mxu1 }
 0x143   :  { %v2498_v28 = vadd.f32 %v373_v25, %v136_v21  ;;  %v2501_v29 = vadd.f32 %v446_v27, %v2491_v17 }
 0x147   :  { %v377_v30 = vpop.f32.mrb[4].mxu0  ;;  %v450_v31 = vpop.f32.mrb[4].mxu1 }
 0x148   :  { %v2503_v32 = vadd.f32 %v377_v30, %v132_v18  ;;  %v379_v35 = vpop.f32.mrb[5].mxu0  ;;  %v2506_v44 = vadd.f32 %v450_v31, %v2485_v14  ;;  %v452_v53 = vpop.f32.mrb[5].mxu1 }
 0x149   :  { %v2508_v62 = vadd.f32 %v379_v35, %v136_v21  ;;  %v381_v6 = vpop.f32.mrb[6].mxu0  ;;  %v2511_v7 = vadd.f32 %v452_v53, %v2491_v17  ;;  %v454_v8 = vpop.f32.mrb[6].mxu1 }
 0x14a   :  { %v2513_v9 = vadd.f32 %v381_v6, %v132_v18  ;;  %v383_v10 = vpop.f32.mrb[7].mxu0  ;;  %v2516_v11 = vadd.f32 %v454_v8, %v2485_v14  ;;  %v456_v12 = vpop.f32.mrb[7].mxu1 }
 0x14b   :  { %2883 = vst [vmem:[#allocation17_spill] sm:$0xff] %v2511_v7  ;;  %v2518_v13 = vadd.f32 %v383_v10, %v136_v21  ;;  %v2521_v22 = vadd.f32 %v456_v12, %v2491_v17 }
 0x14c   :  { %2884 = vst [vmem:[#allocation18_spill] sm:$0xff] %v2513_v9  ;;  %2885 = vst [vmem:[#allocation19_spill] sm:$0xff] %v2516_v11 }
 0x14d   :  { %2886 = vst [vmem:[#allocation20_spill] sm:$0xff] %v2518_v13  ;;  %2887 = vst [vmem:[#allocation21_spill] sm:$0xff] %v2521_v22 }
 0x14f   :  { %v387_v23 = vpop.f32.mrb[8].mxu0  ;;  %v460_v25 = vpop.f32.mrb[8].mxu1 }
 0x150   :  { %v2523_v27 = vadd.f32 %v387_v23, %v132_v18  ;;  %v389_v30 = vpop.f32.mrb[9].mxu0  ;;  %v2526_v31 = vadd.f32 %v460_v25, %v2485_v14  ;;  %v462_v35 = vpop.f32.mrb[9].mxu1 }
 0x151   :  { %v2528_v53 = vadd.f32 %v389_v30, %v136_v21  ;;  %v391_v6 = vpop.f32.mrb[10].mxu0  ;;  %v2531_v8 = vadd.f32 %v462_v35, %v2491_v17  ;;  %v464_v10 = vpop.f32.mrb[10].mxu1 }
 0x152   :  { %2888 = vst [vmem:[#allocation22_spill] sm:$0xff] %v2523_v27  ;;  %2889 = vst [vmem:[#allocation23_spill] sm:$0xff] %v2526_v31  ;;  %v2533_v0 = vadd.f32 %v391_v6, %v132_v18  ;;  %v393_v12 = vpop.f32.mrb[11].mxu0  ;;  %v2536_v22 = vadd.f32 %v464_v10, %v2485_v14  ;;  %v466_v23 = vpop.f32.mrb[11].mxu1 }
 0x153   :  { %2890 = vst [vmem:[#allocation24_spill] sm:$0xff] %v2528_v53  ;;  %2891 = vst [vmem:[#allocation25_spill] sm:$0xff] %v2531_v8  ;;  %v2538_v27 = vadd.f32 %v393_v12, %v136_v21  ;;  %v2541_v25 = vadd.f32 %v466_v23, %v2491_v17 }
 0x154   :  { %2892 = vst [vmem:[#allocation26_spill] sm:$0xff] %v2533_v0  ;;  %2893 = vst [vmem:[#allocation27_spill] sm:$0xff] %v2536_v22 }
 0x155   :  { %2894 = vst [vmem:[#allocation28_spill] sm:$0xff] %v2538_v27  ;;  %2895 = vst [vmem:[#allocation29_spill] sm:$0xff] %v2541_v25 }
 0x157   :  { %v397_v31 = vpop.f32.mrb[12].mxu0  ;;  %v470_v30 = vpop.f32.mrb[12].mxu1 }
 0x158   :  { %v2543_v53 = vadd.f32 %v397_v31, %v132_v18  ;;  %v399_v13 = vpop.f32.mrb[13].mxu0  ;;  %v2546_v35 = vadd.f32 %v470_v30, %v2485_v14  ;;  %v472_v6 = vpop.f32.mrb[13].mxu1 }
 0x159   :  { %v2548_v0 = vadd.f32 %v399_v13, %v136_v21  ;;  %v401_v8 = vpop.f32.mrb[14].mxu0  ;;  %v2551_v10 = vadd.f32 %v472_v6, %v2491_v17  ;;  %v474_v12 = vpop.f32.mrb[14].mxu1  ;;  %v368_v13 = vadd.f32 %v2487_v15, %v132_v18  ;;  %v370_v6 = vadd.f32 %v369_v19, %v136_v21 }
 0x15a   :  { %2896 = vst [vmem:[#allocation30_spill] sm:$0xff] %v2543_v53  ;;  %2897 = vst [vmem:[#allocation31_spill] sm:$0xff] %v2546_v35  ;;  %v2553_v27 = vadd.f32 %v401_v8, %v132_v18  ;;  %v403_v23 = vpop.f32.mrb[15].mxu0  ;;  %v2556_v25 = vadd.f32 %v474_v12, %v2485_v14  ;;  %v476_v31 = vpop.f32.mrb[15].mxu1 }
 0x15b   :  { %2898 = vst [vmem:[#allocation32_spill] sm:$0xff] %v2548_v0  ;;  %2899 = vst [vmem:[#allocation33_spill] sm:$0xff] %v2551_v10  ;;  %v2558_v53 = vadd.f32 %v403_v23, %v136_v21  ;;  %v2561_v30 = vadd.f32 %v476_v31, %v2491_v17  ;;  %v441_v0 = vadd.f32 %v2489_v16, %v2485_v14 }
 0x15c   :  { %2900 = vst [vmem:[#allocation34_spill] sm:$0xff] %v2553_v27  ;;  %2901 = vst [vmem:[#allocation35_spill] sm:$0xff] %v2556_v25  ;;  %v443_v10 = vadd.f32 %v442_v20, %v2491_v17 }
 0x15d   :  { %2902 = vst [vmem:[#allocation36_spill] sm:$0xff] %v2558_v53  ;;  %2903 = vst [vmem:[#allocation37_spill] sm:$0xff] %v2561_v30 }
 0x15f   :  { %v708_v8 = vpop.f32.mrb[16].mxu0  ;;  %v749_v27 = vpop.f32.mrb[16].mxu1 }
 0x160   :  { %v756_v35 = vadd.f32 %v708_v8, %v368_v13  ;;  %v758_v22 = vadd.f32 %v749_v27, %v441_v0  ;;  %v710_v12 = vpop.f32.mrb[17].mxu0  ;;  %v751_v25 = vpop.f32.mrb[17].mxu1 }
 0x161   :  { %v757_v11 = vadd.f32 %v710_v12, %v370_v6  ;;  %v759_v23 = vadd.f32 %v751_v25, %v443_v10  ;;  %v712_v53 = vpop.f32.mrb[18].mxu0  ;;  %v753_v9 = vpop.f32.mrb[18].mxu1 }
 0x162   :  { %v1764_v31 = vmul.f32 -1.442695, %v756_v35  ;;  %v713_v30 = vpop.f32.mrb[19].mxu0  ;;  %v754_v7 = vpop.f32.mrb[19].mxu1  ;;  %v1766_v14 = vmul.f32 -1.442695, %v758_v22 }
 0x163   :  { %v1765_v15 = vmul.f32 -1.442695, %v757_v11  ;;  %v2904_v30 = vmov 0  }
 0x164   :  { %1947 = vpow2.f32 %v1764_v31 }
 0x165   :  { %1949 = vpow2.f32 %v1765_v15 }
 0x166   :  { %1951 = vtanh.f32 %v759_v23 }
 0x167   :  { %1953 = vpow2.f32 %v1766_v14 }
 0x16e   :  { %v1948_v16 = vpop.eup %1947 }
 0x16f   :  { %v769_v18 = vadd.f32 1.0, %v1948_v16  ;;  %v1950_v17 = vpop.eup %1949 }
 0x170   :  { %v770_v0 = vadd.f32 1.0, %v1950_v17  ;;  %v1952_v19 = vpop.eup %1951 }
 0x171   :  { %1955 = vrcp.f32 %v769_v18  ;;  %v1954_v20 = vpop.eup %1953 }
 0x172   :  { %1957 = vrcp.f32 %v770_v0  ;;  %v771_v53 = vadd.f32 1.0, %v1954_v20 }
 0x174   :  { %1959 = vrcp.f32 %v771_v53 }
 0x17b   :  { %v1956_v21 = vpop.eup %1955 }
 0x17c   :  { %v780_v27 = vmul.f32 %v1956_v21, %v1952_v19  ;;  %v1958_v9 = vpop.eup %1957 }
 0x17d   :  { %v779_v25 = vmul.f32 0.0, %v1958_v9 }
 0x17e   :  { %v1960_v11 = vpop.eup %1959 }
 0x17f   :  { %v2567_v7 = vadd.f32 %v780_v27, %v779_v25 }
 0x181   :  { %1961 = vtanh.f32 %v2567_v7 }
 0x18b   :  { %v1962_v22 = vpop.eup %1961 }
 0x18c   :  { %v783_v35 = vmul.f32 %v1962_v22, %v1960_v11 }
 0x18e   :  { %v784_v10 = vpack.c.bf16 %v783_v35, %v783_v35 }
 0x190   :  { %818 = vmatmul.mubr.bf16.vlgmr.msra.gmra.mrb[20].mxu0 %v784_v10  ;;  %859 = vmatmul.mubr.bf16.vlgmr.msra.gmra.mrb[20].mxu1 %v784_v10 }
 0x191   :  { %897 = vmatpush1.bf16.msra.mxu0 %v2346_v36  ;;  %938 = vmatpush1.bf16.msra.mxu1 %v2348_v37 }
 0x192   :  { %898 = vmatprep.subr.bf16.mxu0 %v2352_v38  ;;  %939 = vmatprep.subr.bf16.mxu1 %v2354_v39 }
 0x193   :  { %928 = vmatprep.mubr.bf16.mxu0 %v2904_v30  ;;  %969 = vmatprep.mubr.bf16.mxu1 %v2904_v30 }
 0x195   :  { %899 = vmatpush1.bf16.msra.mxu0 %v2356_v40  ;;  %940 = vmatpush1.bf16.msra.mxu1 %v2360_v41 }
 0x196   :  { %900 = vmatprep.subr.bf16.mxu0 %v2364_v42  ;;  %941 = vmatprep.subr.bf16.mxu1 %v2366_v43 }
 0x199   :  { %901 = vmatpush1.bf16.msra.mxu0 %v2370_v45  ;;  %942 = vmatpush1.bf16.msra.mxu1 %v2372_v46 }
 0x19a   :  { %902 = vmatprep.subr.bf16.mxu0 %v2376_v47  ;;  %943 = vmatprep.subr.bf16.mxu1 %v2380_v48 }
 0x19d   :  { %903 = vmatpush1.bf16.msra.mxu0 %v2382_v49  ;;  %944 = vmatpush1.bf16.msra.mxu1 %v2384_v50 }
 0x19e   :  { %904 = vmatprep.subr.bf16.mxu0 %v2388_v51  ;;  %945 = vmatprep.subr.bf16.mxu1 %v2392_v52 }
 0x1a1   :  { %905 = vmatpush1.bf16.msra.mxu0 %v2396_v54  ;;  %946 = vmatpush1.bf16.msra.mxu1 %v2398_v55 }
 0x1a2   :  { %906 = vmatprep.subr.bf16.mxu0 %v2400_v56  ;;  %947 = vmatprep.subr.bf16.mxu1 %v2402_v57 }
 0x1a5   :  { %907 = vmatpush1.bf16.msra.mxu0 %v2410_v58  ;;  %948 = vmatpush1.bf16.msra.mxu1 %v2412_v59 }
 0x1a6   :  { %908 = vmatprep.subr.bf16.mxu0 %v2416_v60  ;;  %949 = vmatprep.subr.bf16.mxu1 %v2418_v61 }
 0x1a9   :  { %909 = vmatpush1.bf16.msra.mxu0 %v2424_v63  ;;  %950 = vmatpush1.bf16.msra.mxu1 %v2426_v1 }
 0x1aa   :  { %910 = vmatprep.subr.bf16.mxu0 %v2430_v2  ;;  %951 = vmatprep.subr.bf16.mxu1 %v2432_v3 }
 0x1ad   :  { %911 = vmatpush1.bf16.msra.mxu0 %v2436_v4  ;;  %952 = vmatpush1.bf16.msra.mxu1 %v2438_v5 }
 0x1ae   :  { %1007 = vmatprep.subr.bf16.mxu0 %v2342_v33  ;;  %1048 = vmatprep.subr.bf16.mxu1 %v2344_v34 }
 0x263   :  { %v819_v13 = vpop.f32.mrb[20].mxu0  ;;  %v860_v6 = vpop.f32.mrb[20].mxu1 }
 0x264   :  { %v867_v8 = vadd.f32 %v819_v13, %v2493_v24  ;;  %v869_v12 = vadd.f32 %v860_v6, %v2496_v26  ;;  %v821_v23 = vpop.f32.mrb[21].mxu0  ;;  %v862_v31 = vpop.f32.mrb[21].mxu1 }
 0x265   :  { %v868_v15 = vadd.f32 %v821_v23, %v2498_v28  ;;  %v870_v14 = vadd.f32 %v862_v31, %v2501_v29  ;;  %v823_v16 = vpop.f32.mrb[22].mxu0  ;;  %v864_v18 = vpop.f32.mrb[22].mxu1 }
 0x266   :  { %v1767_v17 = vmul.f32 -1.442695, %v867_v8  ;;  %v824_v0 = vpop.f32.mrb[23].mxu0  ;;  %v865_v19 = vpop.f32.mrb[23].mxu1  ;;  %v1769_v21 = vmul.f32 -1.442695, %v869_v12 }
 0x267   :  { %v1768_v20 = vmul.f32 -1.442695, %v868_v15 }
 0x268   :  { %1963 = vpow2.f32 %v1767_v17  ;;  %v2905_v17 = vld [vmem:[#allocation17_spill] sm:$0xff] }
 0x269   :  { %1965 = vpow2.f32 %v1768_v20 }
 0x26a   :  { %1967 = vtanh.f32 %v870_v14 }
 0x26b   :  { %1969 = vpow2.f32 %v1769_v21 }
 0x272   :  { %v1964_v27 = vpop.eup %1963 }
 0x273   :  { %v880_v9 = vadd.f32 1.0, %v1964_v27  ;;  %v1966_v24 = vpop.eup %1965 }
 0x274   :  { %v881_v26 = vadd.f32 1.0, %v1966_v24  ;;  %v1968_v28 = vpop.eup %1967 }
 0x275   :  { %1971 = vrcp.f32 %v880_v9  ;;  %v1970_v53 = vpop.eup %1969 }
 0x276   :  { %1973 = vrcp.f32 %v881_v26  ;;  %v882_v22 = vadd.f32 1.0, %v1970_v53 }
 0x278   :  { %1975 = vrcp.f32 %v882_v22 }
 0x27f   :  { %v1972_v29 = vpop.eup %1971 }
 0x280   :  { %v891_v25 = vmul.f32 %v1972_v29, %v1968_v28  ;;  %v1974_v11 = vpop.eup %1973 }
 0x281   :  { %v890_v35 = vmul.f32 %v1974_v11, %v2567_v7 }
 0x282   :  { %v1976_v13 = vpop.eup %1975 }
 0x283   :  { %v2609_v10 = vadd.f32 %v891_v25, %v890_v35 }
 0x285   :  { %1977 = vtanh.f32 %v2609_v10 }
 0x28f   :  { %v1978_v6 = vpop.eup %1977 }
 0x290   :  { %v894_v8 = vmul.f32 %v1978_v6, %v1976_v13 }
 0x292   :  { %v895_v12 = vpack.c.bf16 %v894_v8, %v894_v8 }
 0x294   :  { %929 = vmatmul.mubr.bf16.vlgmr.msra.gmra.mrb[24].mxu0 %v895_v12  ;;  %970 = vmatmul.mubr.bf16.vlgmr.msra.gmra.mrb[24].mxu1 %v895_v12 }
 0x295   :  { %1008 = vmatpush1.bf16.msra.mxu0 %v2346_v36  ;;  %1049 = vmatpush1.bf16.msra.mxu1 %v2348_v37 }
 0x296   :  { %1009 = vmatprep.subr.bf16.mxu0 %v2352_v38  ;;  %1050 = vmatprep.subr.bf16.mxu1 %v2354_v39 }
 0x297   :  { %1039 = vmatprep.mubr.bf16.mxu0 %v2904_v30  ;;  %1080 = vmatprep.mubr.bf16.mxu1 %v2904_v30 }
 0x299   :  { %1010 = vmatpush1.bf16.msra.mxu0 %v2356_v40  ;;  %1051 = vmatpush1.bf16.msra.mxu1 %v2360_v41 }
 0x29a   :  { %1011 = vmatprep.subr.bf16.mxu0 %v2364_v42  ;;  %1052 = vmatprep.subr.bf16.mxu1 %v2366_v43 }
 0x29d   :  { %1012 = vmatpush1.bf16.msra.mxu0 %v2370_v45  ;;  %1053 = vmatpush1.bf16.msra.mxu1 %v2372_v46 }
 0x29e   :  { %1013 = vmatprep.subr.bf16.mxu0 %v2376_v47  ;;  %1054 = vmatprep.subr.bf16.mxu1 %v2380_v48 }
 0x2a1   :  { %1014 = vmatpush1.bf16.msra.mxu0 %v2382_v49  ;;  %1055 = vmatpush1.bf16.msra.mxu1 %v2384_v50 }
 0x2a2   :  { %1015 = vmatprep.subr.bf16.mxu0 %v2388_v51  ;;  %1056 = vmatprep.subr.bf16.mxu1 %v2392_v52 }
 0x2a5   :  { %1016 = vmatpush1.bf16.msra.mxu0 %v2396_v54  ;;  %1057 = vmatpush1.bf16.msra.mxu1 %v2398_v55 }
 0x2a6   :  { %1017 = vmatprep.subr.bf16.mxu0 %v2400_v56  ;;  %1058 = vmatprep.subr.bf16.mxu1 %v2402_v57 }
 0x2a9   :  { %1018 = vmatpush1.bf16.msra.mxu0 %v2410_v58  ;;  %1059 = vmatpush1.bf16.msra.mxu1 %v2412_v59 }
 0x2aa   :  { %1019 = vmatprep.subr.bf16.mxu0 %v2416_v60  ;;  %1060 = vmatprep.subr.bf16.mxu1 %v2418_v61 }
 0x2ad   :  { %1020 = vmatpush1.bf16.msra.mxu0 %v2424_v63  ;;  %1061 = vmatpush1.bf16.msra.mxu1 %v2426_v1 }
 0x2ae   :  { %1021 = vmatprep.subr.bf16.mxu0 %v2430_v2  ;;  %1062 = vmatprep.subr.bf16.mxu1 %v2432_v3 }
 0x2b1   :  { %1022 = vmatpush1.bf16.msra.mxu0 %v2436_v4  ;;  %1063 = vmatpush1.bf16.msra.mxu1 %v2438_v5 }
 0x2b2   :  { %1118 = vmatprep.subr.bf16.mxu0 %v2342_v33  ;;  %1159 = vmatprep.subr.bf16.mxu1 %v2344_v34 }
 0x367   :  { %v930_v7 = vpop.f32.mrb[24].mxu0  ;;  %v971_v23 = vpop.f32.mrb[24].mxu1 }
 0x368   :  { %v978_v31 = vadd.f32 %v930_v7, %v2503_v32  ;;  %v980_v15 = vadd.f32 %v971_v23, %v2506_v44  ;;  %v932_v14 = vpop.f32.mrb[25].mxu0  ;;  %v973_v16 = vpop.f32.mrb[25].mxu1 }
 0x369   :  { %v979_v18 = vadd.f32 %v932_v14, %v2508_v62  ;;  %v981_v0 = vadd.f32 %v973_v16, %v2905_v17  ;;  %v934_v19 = vpop.f32.mrb[26].mxu0  ;;  %v975_v20 = vpop.f32.mrb[26].mxu1  ;;  %v2907_v16 = vld [vmem:[#allocation19_spill] sm:$0xff] }
 0x36a   :  { %v1770_v21 = vmul.f32 -1.442695, %v978_v31  ;;  %v935_v27 = vpop.f32.mrb[27].mxu0  ;;  %v976_v9 = vpop.f32.mrb[27].mxu1  ;;  %v1772_v26 = vmul.f32 -1.442695, %v980_v15 }
 0x36b   :  { %v1771_v24 = vmul.f32 -1.442695, %v979_v18  ;;  %v2906_v15 = vld [vmem:[#allocation18_spill] sm:$0xff]  ;;  %v2908_v19 = vld [vmem:[#allocation20_spill] sm:$0xff] }
 0x36c   :  { %1979 = vpow2.f32 %v1770_v21  ;;  %v2909_v21 = vld [vmem:[#allocation21_spill] sm:$0xff] }
 0x36d   :  { %1981 = vpow2.f32 %v1771_v24 }
 0x36e   :  { %1983 = vtanh.f32 %v981_v0 }
 0x36f   :  { %1985 = vpow2.f32 %v1772_v26 }
 0x376   :  { %v1980_v28 = vpop.eup %1979 }
 0x377   :  { %v991_v53 = vadd.f32 1.0, %v1980_v28  ;;  %v1982_v32 = vpop.eup %1981 }
 0x378   :  { %v992_v44 = vadd.f32 1.0, %v1982_v32  ;;  %v1984_v62 = vpop.eup %1983 }
 0x379   :  { %1987 = vrcp.f32 %v991_v53  ;;  %v1986_v29 = vpop.eup %1985 }
 0x37a   :  { %1989 = vrcp.f32 %v992_v44  ;;  %v993_v35 = vadd.f32 1.0, %v1986_v29 }
 0x37c   :  { %1991 = vrcp.f32 %v993_v35 }
 0x383   :  { %v1988_v25 = vpop.eup %1987 }
 0x384   :  { %v1002_v11 = vmul.f32 %v1988_v25, %v1984_v62  ;;  %v1990_v22 = vpop.eup %1989 }
 0x385   :  { %v1001_v13 = vmul.f32 %v1990_v22, %v2609_v10 }
 0x386   :  { %v1992_v8 = vpop.eup %1991 }
 0x387   :  { %v2651_v6 = vadd.f32 %v1002_v11, %v1001_v13 }
 0x389   :  { %1993 = vtanh.f32 %v2651_v6 }
 0x393   :  { %v1994_v12 = vpop.eup %1993 }
 0x394   :  { %v1005_v7 = vmul.f32 %v1994_v12, %v1992_v8 }
 0x396   :  { %v1006_v23 = vpack.c.bf16 %v1005_v7, %v1005_v7 }
 0x398   :  { %1040 = vmatmul.mubr.bf16.vlgmr.msra.gmra.mrb[28].mxu0 %v1006_v23  ;;  %1081 = vmatmul.mubr.bf16.vlgmr.msra.gmra.mrb[28].mxu1 %v1006_v23 }
 0x399   :  { %1119 = vmatpush1.bf16.msra.mxu0 %v2346_v36  ;;  %1160 = vmatpush1.bf16.msra.mxu1 %v2348_v37 }
 0x39a   :  { %1120 = vmatprep.subr.bf16.mxu0 %v2352_v38  ;;  %1161 = vmatprep.subr.bf16.mxu1 %v2354_v39 }
 0x39b   :  { %1150 = vmatprep.mubr.bf16.mxu0 %v2904_v30  ;;  %1191 = vmatprep.mubr.bf16.mxu1 %v2904_v30 }
 0x39d   :  { %1121 = vmatpush1.bf16.msra.mxu0 %v2356_v40  ;;  %1162 = vmatpush1.bf16.msra.mxu1 %v2360_v41 }
 0x39e   :  { %1122 = vmatprep.subr.bf16.mxu0 %v2364_v42  ;;  %1163 = vmatprep.subr.bf16.mxu1 %v2366_v43 }
 0x3a1   :  { %1123 = vmatpush1.bf16.msra.mxu0 %v2370_v45  ;;  %1164 = vmatpush1.bf16.msra.mxu1 %v2372_v46 }
 0x3a2   :  { %1124 = vmatprep.subr.bf16.mxu0 %v2376_v47  ;;  %1165 = vmatprep.subr.bf16.mxu1 %v2380_v48 }
 0x3a5   :  { %1125 = vmatpush1.bf16.msra.mxu0 %v2382_v49  ;;  %1166 = vmatpush1.bf16.msra.mxu1 %v2384_v50 }
 0x3a6   :  { %1126 = vmatprep.subr.bf16.mxu0 %v2388_v51  ;;  %1167 = vmatprep.subr.bf16.mxu1 %v2392_v52 }
 0x3a9   :  { %1127 = vmatpush1.bf16.msra.mxu0 %v2396_v54  ;;  %1168 = vmatpush1.bf16.msra.mxu1 %v2398_v55 }
 0x3aa   :  { %1128 = vmatprep.subr.bf16.mxu0 %v2400_v56  ;;  %1169 = vmatprep.subr.bf16.mxu1 %v2402_v57 }
 0x3ad   :  { %1129 = vmatpush1.bf16.msra.mxu0 %v2410_v58  ;;  %1170 = vmatpush1.bf16.msra.mxu1 %v2412_v59 }
 0x3ae   :  { %1130 = vmatprep.subr.bf16.mxu0 %v2416_v60  ;;  %1171 = vmatprep.subr.bf16.mxu1 %v2418_v61 }
 0x3b1   :  { %1131 = vmatpush1.bf16.msra.mxu0 %v2424_v63  ;;  %1172 = vmatpush1.bf16.msra.mxu1 %v2426_v1 }
 0x3b2   :  { %1132 = vmatprep.subr.bf16.mxu0 %v2430_v2  ;;  %1173 = vmatprep.subr.bf16.mxu1 %v2432_v3 }
 0x3b5   :  { %1133 = vmatpush1.bf16.msra.mxu0 %v2436_v4  ;;  %1174 = vmatpush1.bf16.msra.mxu1 %v2438_v5 }
 0x3b6   :  { %1229 = vmatprep.subr.bf16.mxu0 %v2342_v33  ;;  %1270 = vmatprep.subr.bf16.mxu1 %v2344_v34 }
 0x46b   :  { %v1041_v10 = vpop.f32.mrb[28].mxu0  ;;  %v1082_v31 = vpop.f32.mrb[28].mxu1 }
 0x46c   :  { %v1089_v14 = vadd.f32 %v1041_v10, %v2906_v15  ;;  %v1091_v18 = vadd.f32 %v1082_v31, %v2907_v16  ;;  %v1043_v17 = vpop.f32.mrb[29].mxu0  ;;  %v1084_v0 = vpop.f32.mrb[29].mxu1 }
 0x46d   :  { %v1090_v20 = vadd.f32 %v1043_v17, %v2908_v19  ;;  %v1092_v27 = vadd.f32 %v1084_v0, %v2909_v21  ;;  %v1045_v9 = vpop.f32.mrb[30].mxu0  ;;  %v1086_v24 = vpop.f32.mrb[30].mxu1 }
 0x46e   :  { %v1773_v26 = vmul.f32 -1.442695, %v1089_v14  ;;  %v1046_v28 = vpop.f32.mrb[31].mxu0  ;;  %v1087_v53 = vpop.f32.mrb[31].mxu1  ;;  %v1775_v34 = vmul.f32 -1.442695, %v1091_v18 }
 0x46f   :  { %v1774_v33 = vmul.f32 -1.442695, %v1090_v20 }
 0x470   :  { %1995 = vpow2.f32 %v1773_v26 }
 0x471   :  { %1997 = vpow2.f32 %v1774_v33 }
 0x472   :  { %1999 = vtanh.f32 %v1092_v27 }
 0x473   :  { %2001 = vpow2.f32 %v1775_v34 }
 0x47a   :  { %v1996_v32 = vpop.eup %1995 }
 0x47b   :  { %v1102_v44 = vadd.f32 1.0, %v1996_v32  ;;  %v1998_v62 = vpop.eup %1997  ;;  %v2742_v32 = vld [vmem:[#allocation9] ss:$16 sps:$4 sm:$0xff]  }
 0x47c   :  { %v1103_v29 = vadd.f32 1.0, %v1998_v62  ;;  %v2000_v25 = vpop.eup %1999  ;;  %v2748_v62 = vld [vmem:[#allocation9 + $0x24] ss:$16 sps:$4 sm:$0xff]  }
 0x47d   :  { %2003 = vrcp.f32 %v1102_v44  ;;  %v2002_v11 = vpop.eup %2001  ;;  %v2745_v44 = vld [vmem:[#allocation9 + $0x8] ss:$16 sps:$4 sm:$0xff]  }
 0x47e   :  { %2005 = vrcp.f32 %v1103_v29  ;;  %v1104_v8 = vadd.f32 1.0, %v2002_v11  ;;  %v2751_v29 = vld [vmem:[#allocation9 + $0x2c] ss:$16 sps:$4 sm:$0xff]   ;;  %v2759_v11 = vld [vmem:[#allocation9 + $0x28] ss:$16 sps:$4 sm:$0xff]  }
 0x480   :  { %2007 = vrcp.f32 %v1104_v8  ;;  %v2771_v8 = vld [vmem:[#allocation9 + $0x48] ss:$16 sps:$4 sm:$0xff]  }
 0x487   :  { %v2004_v22 = vpop.eup %2003 }
 0x488   :  { %v1113_v35 = vmul.f32 %v2004_v22, %v2000_v25  ;;  %v2006_v13 = vpop.eup %2005  ;;  %v2756_v25 = vld [vmem:[#allocation9 + $0x20] ss:$16 sps:$4 sm:$0xff]   ;;  %v2762_v22 = vld [vmem:[#allocation9 + $0x44] ss:$16 sps:$4 sm:$0xff]  }
 0x489   :  { %v1112_v12 = vmul.f32 %v2006_v13, %v2651_v6  ;;  %v2768_v13 = vld [vmem:[#allocation9 + $0x40] ss:$16 sps:$4 sm:$0xff]  }
 0x48a   :  { %v2008_v23 = vpop.eup %2007 }
 0x48b   :  { %v2693_v7 = vadd.f32 %v1113_v35, %v1112_v12  ;;  %v2765_v35 = vld [vmem:[#allocation9 + $0x4c] ss:$16 sps:$4 sm:$0xff]   ;;  %v2774_v12 = vld [vmem:[#allocation9 + $0x64] ss:$16 sps:$4 sm:$0xff]  }
 0x48d   :  { %2009 = vtanh.f32 %v2693_v7 }
 0x497   :  { %v2010_v10 = vpop.eup %2009 }
 0x498   :  { %v1116_v31 = vmul.f32 %v2010_v10, %v2008_v23  ;;  %v2780_v23 = vld [vmem:[#allocation9 + $0x60] ss:$16 sps:$4 sm:$0xff]   ;;  %v2783_v10 = vld [vmem:[#allocation9 + $0x68] ss:$16 sps:$4 sm:$0xff]  }
 0x49a   :  { %v1117_v15 = vpack.c.bf16 %v1116_v31, %v1116_v31  ;;  %v2786_v31 = vld [vmem:[#allocation9 + $0x84] ss:$16 sps:$4 sm:$0xff]  }
 0x49c   :  { %1151 = vmatmul.mubr.bf16.vlgmr.msra.gmra.mrb[32].mxu0 %v1117_v15  ;;  %1192 = vmatmul.mubr.bf16.vlgmr.msra.gmra.mrb[32].mxu1 %v1117_v15  ;;  %v2789_v15 = vld [vmem:[#allocation9 + $0x8c] ss:$16 sps:$4 sm:$0xff]  }
 0x49d   :  { %1230 = vmatpush1.bf16.msra.mxu0 %v2346_v36  ;;  %1271 = vmatpush1.bf16.msra.mxu1 %v2348_v37  ;;  %v2728_v36 = vld [vmem:[#allocation9 + $0x4] ss:$16 sps:$4 sm:$0xff]   ;;  %v2731_v37 = vld [vmem:[#allocation9 + $0xc] ss:$16 sps:$4 sm:$0xff]  }
 0x49e   :  { %1231 = vmatprep.subr.bf16.mxu0 %v2352_v38  ;;  %1272 = vmatprep.subr.bf16.mxu1 %v2354_v39 }
 0x49f   :  { %1261 = vmatprep.mubr.bf16.mxu0 %v2904_v30  ;;  %1302 = vmatprep.mubr.bf16.mxu1 %v2904_v30 }
 0x4a1   :  { %1232 = vmatpush1.bf16.msra.mxu0 %v2356_v40  ;;  %1273 = vmatpush1.bf16.msra.mxu1 %v2360_v41  ;;  %v2910_v40 = vld [vmem:[#allocation22_spill] sm:$0xff] }
 0x4a2   :  { %1233 = vmatprep.subr.bf16.mxu0 %v2364_v42  ;;  %1274 = vmatprep.subr.bf16.mxu1 %v2366_v43  ;;  %v2911_v42 = vld [vmem:[#allocation23_spill] sm:$0xff] }
 0x4a5   :  { %1234 = vmatpush1.bf16.msra.mxu0 %v2370_v45  ;;  %1275 = vmatpush1.bf16.msra.mxu1 %v2372_v46 }
 0x4a6   :  { %1235 = vmatprep.subr.bf16.mxu0 %v2376_v47  ;;  %1276 = vmatprep.subr.bf16.mxu1 %v2380_v48  ;;  %v2912_v47 = vld [vmem:[#allocation24_spill] sm:$0xff] }
 0x4a9   :  { %1236 = vmatpush1.bf16.msra.mxu0 %v2382_v49  ;;  %1277 = vmatpush1.bf16.msra.mxu1 %v2384_v50  ;;  %v2913_v49 = vld [vmem:[#allocation25_spill] sm:$0xff] }
 0x4aa   :  { %1237 = vmatprep.subr.bf16.mxu0 %v2388_v51  ;;  %1278 = vmatprep.subr.bf16.mxu1 %v2392_v52 }
 0x4ad   :  { %1238 = vmatpush1.bf16.msra.mxu0 %v2396_v54  ;;  %1279 = vmatpush1.bf16.msra.mxu1 %v2398_v55 }
 0x4ae   :  { %1239 = vmatprep.subr.bf16.mxu0 %v2400_v56  ;;  %1280 = vmatprep.subr.bf16.mxu1 %v2402_v57 }
 0x4b1   :  { %1240 = vmatpush1.bf16.msra.mxu0 %v2410_v58  ;;  %1281 = vmatpush1.bf16.msra.mxu1 %v2412_v59 }
 0x4b2   :  { %1241 = vmatprep.subr.bf16.mxu0 %v2416_v60  ;;  %1282 = vmatprep.subr.bf16.mxu1 %v2418_v61 }
 0x4b5   :  { %1242 = vmatpush1.bf16.msra.mxu0 %v2424_v63  ;;  %1283 = vmatpush1.bf16.msra.mxu1 %v2426_v1 }
 0x4b6   :  { %1243 = vmatprep.subr.bf16.mxu0 %v2430_v2  ;;  %1284 = vmatprep.subr.bf16.mxu1 %v2432_v3 }
 0x4b9   :  { %1244 = vmatpush1.bf16.msra.mxu0 %v2436_v4  ;;  %1285 = vmatpush1.bf16.msra.mxu1 %v2438_v5 }
 0x4ba   :  { %1340 = vmatprep.subr.bf16.mxu0 %v2728_v36  ;;  %1381 = vmatprep.subr.bf16.mxu1 %v2731_v37 }
 0x56f   :  { %v1152_v38 = vpop.f32.mrb[32].mxu0  ;;  %v1193_v39 = vpop.f32.mrb[32].mxu1 }
 0x570   :  { %v1200_v41 = vadd.f32 %v1152_v38, %v2910_v40  ;;  %v1202_v43 = vadd.f32 %v1193_v39, %v2911_v42  ;;  %v1154_v45 = vpop.f32.mrb[33].mxu0  ;;  %v1195_v46 = vpop.f32.mrb[33].mxu1  ;;  %v2792_v38 = vld [vmem:[#allocation9 + $0x80] ss:$16 sps:$4 sm:$0xff]   ;;  %v2795_v39 = vld [vmem:[#allocation9 + $0x88] ss:$16 sps:$4 sm:$0xff]  }
 0x571   :  { %v1201_v48 = vadd.f32 %v1154_v45, %v2912_v47  ;;  %v1203_v50 = vadd.f32 %v1195_v46, %v2913_v49  ;;  %v1156_v51 = vpop.f32.mrb[34].mxu0  ;;  %v1197_v52 = vpop.f32.mrb[34].mxu1  ;;  %v2798_v40 = vld [vmem:[#allocation9 + $0xa4] ss:$16 sps:$4 sm:$0xff]   ;;  %v2915_v42 = vld [vmem:[#allocation27_spill] sm:$0xff]  ;;  %v2917_v46 = vld [vmem:[#allocation29_spill] sm:$0xff] }
 0x572   :  { %v1776_v54 = vmul.f32 -1.442695, %v1200_v41  ;;  %v1157_v55 = vpop.f32.mrb[35].mxu0  ;;  %v1198_v56 = vpop.f32.mrb[35].mxu1  ;;  %v1778_v6 = vmul.f32 -1.442695, %v1202_v43 }
 0x573   :  { %v1777_v57 = vmul.f32 -1.442695, %v1201_v48  ;;  %v2801_v41 = vld [vmem:[#allocation9 + $0xac] ss:$16 sps:$4 sm:$0xff]   ;;  %v2916_v45 = vld [vmem:[#allocation28_spill] sm:$0xff] }
 0x574   :  { %2011 = vpow2.f32 %v1776_v54 }
 0x575   :  { %2013 = vpow2.f32 %v1777_v57 }
 0x576   :  { %2015 = vtanh.f32 %v1203_v50 }
 0x577   :  { %2017 = vpow2.f32 %v1778_v6 }
 0x57e   :  { %v2012_v14 = vpop.eup %2011 }
 0x57f   :  { %v1213_v16 = vadd.f32 1.0, %v2012_v14  ;;  %v2014_v18 = vpop.eup %2013 }
 0x580   :  { %v1214_v17 = vadd.f32 1.0, %v2014_v18  ;;  %v2016_v0 = vpop.eup %2015 }
 0x581   :  { %2019 = vrcp.f32 %v1213_v16  ;;  %v2018_v19 = vpop.eup %2017 }
 0x582   :  { %2021 = vrcp.f32 %v1214_v17  ;;  %v1215_v9 = vadd.f32 1.0, %v2018_v19 }
 0x584   :  { %2023 = vrcp.f32 %v1215_v9  ;;  %v2099_v9 = vld [vmem:[#allocation9 + $0xc4] ss:$16 sps:$4 sm:$0xff]  }
 0x58b   :  { %v2020_v20 = vpop.eup %2019 }
 0x58c   :  { %v1224_v21 = vmul.f32 %v2020_v20, %v2016_v0  ;;  %v2022_v27 = vpop.eup %2021 }
 0x58d   :  { %v1223_v24 = vmul.f32 %v2022_v27, %v2693_v7  ;;  %v2777_v7 = vld [vmem:[#allocation9 + $0x6c] ss:$16 sps:$4 sm:$0xff]   ;;  %v2098_v27 = vld [vmem:[#allocation9 + $0xa8] ss:$16 sps:$4 sm:$0xff]  }
 0x58e   :  { %v2024_v28 = vpop.eup %2023 }
 0x58f   :  { %v2739_v26 = vadd.f32 %v1224_v21, %v1223_v24  ;;  %v2100_v24 = vld [vmem:[#allocation9 + $0xcc] ss:$16 sps:$4 sm:$0xff]  }
 0x591   :  { %2025 = vtanh.f32 %v2739_v26 }
 0x59b   :  { %v2026_v53 = vpop.eup %2025 }
 0x59c   :  { %v1227_v33 = vmul.f32 %v2026_v53, %v2024_v28  ;;  %v2102_v28 = vld [vmem:[#allocation9 + $0xc8] ss:$16 sps:$4 sm:$0xff]   ;;  %v2103_v53 = vld [vmem:[#allocation9 + $0xe4] ss:$16 sps:$4 sm:$0xff]  }
 0x59e   :  { %v1228_v34 = vpack.c.bf16 %v1227_v33, %v1227_v33  ;;  %v2104_v33 = vld [vmem:[#allocation9 + $0xec] ss:$16 sps:$4 sm:$0xff]  }
 0x5a0   :  { %1262 = vmatmul.mubr.bf16.vlgmr.msra.gmra.mrb[36].mxu0 %v1228_v34  ;;  %1303 = vmatmul.mubr.bf16.vlgmr.msra.gmra.mrb[36].mxu1 %v1228_v34  ;;  %v2105_v34 = vld [vmem:[#allocation9 + $0xe0] ss:$16 sps:$4 sm:$0xff]  }
 0x5a1   :  { %1341 = vmatpush1.bf16.msra.mxu0 %v2742_v32  ;;  %1382 = vmatpush1.bf16.msra.mxu1 %v2745_v44 }
 0x5a2   :  { %1342 = vmatprep.subr.bf16.mxu0 %v2748_v62  ;;  %1383 = vmatprep.subr.bf16.mxu1 %v2751_v29 }
 0x5a3   :  { %1372 = vmatprep.mubr.bf16.mxu0 %v2904_v30  ;;  %1413 = vmatprep.mubr.bf16.mxu1 %v2904_v30 }
 0x5a5   :  { %1343 = vmatpush1.bf16.msra.mxu0 %v2756_v25  ;;  %1384 = vmatpush1.bf16.msra.mxu1 %v2759_v11 }
 0x5a6   :  { %1344 = vmatprep.subr.bf16.mxu0 %v2762_v22  ;;  %1385 = vmatprep.subr.bf16.mxu1 %v2765_v35 }
 0x5a9   :  { %1345 = vmatpush1.bf16.msra.mxu0 %v2768_v13  ;;  %1386 = vmatpush1.bf16.msra.mxu1 %v2771_v8 }
 0x5aa   :  { %1346 = vmatprep.subr.bf16.mxu0 %v2774_v12  ;;  %1387 = vmatprep.subr.bf16.mxu1 %v2777_v7 }
 0x5ad   :  { %1347 = vmatpush1.bf16.msra.mxu0 %v2780_v23  ;;  %1388 = vmatpush1.bf16.msra.mxu1 %v2783_v10 }
 0x5ae   :  { %1348 = vmatprep.subr.bf16.mxu0 %v2786_v31  ;;  %1389 = vmatprep.subr.bf16.mxu1 %v2789_v15 }
 0x5b1   :  { %1349 = vmatpush1.bf16.msra.mxu0 %v2792_v38  ;;  %1390 = vmatpush1.bf16.msra.mxu1 %v2795_v39 }
 0x5b2   :  { %1350 = vmatprep.subr.bf16.mxu0 %v2798_v40  ;;  %1391 = vmatprep.subr.bf16.mxu1 %v2801_v41 }
 0x5b5   :  { %1351 = vmatpush1.bf16.msra.mxu0 %v2410_v58  ;;  %1392 = vmatpush1.bf16.msra.mxu1 %v2412_v59 }
 0x5b6   :  { %1352 = vmatprep.subr.bf16.mxu0 %v2416_v60  ;;  %1393 = vmatprep.subr.bf16.mxu1 %v2418_v61  ;;  %v2914_v60 = vld [vmem:[#allocation26_spill] sm:$0xff] }
 0x5b9   :  { %1353 = vmatpush1.bf16.msra.mxu0 %v2424_v63  ;;  %1394 = vmatpush1.bf16.msra.mxu1 %v2426_v1 }
 0x5ba   :  { %1354 = vmatprep.subr.bf16.mxu0 %v2430_v2  ;;  %1395 = vmatprep.subr.bf16.mxu1 %v2432_v3 }
 0x5bd   :  { %1355 = vmatpush1.bf16.msra.mxu0 %v2436_v4  ;;  %1396 = vmatpush1.bf16.msra.mxu1 %v2438_v5 }
 0x5be   :  { %1451 = vmatprep.subr.bf16.mxu0 %v2728_v36  ;;  %1492 = vmatprep.subr.bf16.mxu1 %v2731_v37 }
 0x673   :  { %v1263_v58 = vpop.f32.mrb[36].mxu0  ;;  %v1304_v59 = vpop.f32.mrb[36].mxu1 }
 0x674   :  { %v1311_v61 = vadd.f32 %v1263_v58, %v2914_v60  ;;  %v1313_v63 = vadd.f32 %v1304_v59, %v2915_v42  ;;  %v1265_v43 = vpop.f32.mrb[37].mxu0  ;;  %v1306_v1 = vpop.f32.mrb[37].mxu1 }
 0x675   :  { %v1312_v2 = vadd.f32 %v1265_v43, %v2916_v45  ;;  %v1314_v3 = vadd.f32 %v1306_v1, %v2917_v46  ;;  %v1267_v47 = vpop.f32.mrb[38].mxu0  ;;  %v1308_v4 = vpop.f32.mrb[38].mxu1 }
 0x676   :  { %v1779_v48 = vmul.f32 -1.442695, %v1311_v61  ;;  %v1268_v5 = vpop.f32.mrb[39].mxu0  ;;  %v1309_v49 = vpop.f32.mrb[39].mxu1  ;;  %v1781_v37 = vmul.f32 -1.442695, %v1313_v63 }
 0x677   :  { %v1780_v36 = vmul.f32 -1.442695, %v1312_v2  ;;  %v1939_v49 = vld [vmem:[#allocation10] sm:$0xff]  }
 0x678   :  { %2027 = vpow2.f32 %v1779_v48 }
 0x679   :  { %2029 = vpow2.f32 %v1780_v36  ;;  %v2235_v36 = vmov 0.0  }
 0x67a   :  { %2031 = vtanh.f32 %v1314_v3 }
 0x67b   :  { %2033 = vpow2.f32 %v1781_v37  ;;  %v1940_v37 = vld [vmem:[#allocation10 + $0x8] sm:$0xff]  }
 0x682   :  { %v2028_v50 = vpop.eup %2027 }
 0x683   :  { %v1324_v51 = vadd.f32 1.0, %v2028_v50  ;;  %v2030_v52 = vpop.eup %2029  ;;  %v1941_v50 = vld [vmem:[#allocation10 + $0x10] sm:$0xff]  }
 0x684   :  { %v1325_v54 = vadd.f32 1.0, %v2030_v52  ;;  %v2032_v55 = vpop.eup %2031  ;;  %v1943_v52 = vld [vmem:[#allocation10 + $0x20] sm:$0xff]  }
 0x685   :  { %2035 = vrcp.f32 %v1324_v51  ;;  %v2034_v56 = vpop.eup %2033  ;;  %v1942_v51 = vld [vmem:[#allocation10 + $0x18] sm:$0xff]  }
 0x686   :  { %2037 = vrcp.f32 %v1325_v54  ;;  %v1326_v16 = vadd.f32 1.0, %v2034_v56  ;;  %v1944_v54 = vld [vmem:[#allocation10 + $0x28] sm:$0xff]   ;;  %v1946_v56 = vld [vmem:[#allocation10 + $0x38] sm:$0xff]  }
 0x688   :  { %2039 = vrcp.f32 %v1326_v16 }
 0x68f   :  { %v2036_v57 = vpop.eup %2035 }
 0x690   :  { %v1335_v6 = vmul.f32 %v2036_v57, %v2032_v55  ;;  %v2038_v14 = vpop.eup %2037  ;;  %v1945_v55 = vld [vmem:[#allocation10 + $0x30] sm:$0xff]  }
 0x691   :  { %v1334_v18 = vmul.f32 %v2038_v14, %v2739_v26  ;;  %v2101_v26 = vld [vmem:[#allocation9 + $0xc0] ss:$16 sps:$4 sm:$0xff]  }
 0x692   :  { %v2040_v0 = vpop.eup %2039  ;;  %v2922_v14 = vld [vmem:[#allocation34_spill] sm:$0xff] }
 0x693   :  { %v2821_v17 = vadd.f32 %v1335_v6, %v1334_v18  ;;  %v2923_v18 = vld [vmem:[#allocation35_spill] sm:$0xff] }
 0x695   :  { %2041 = vtanh.f32 %v2821_v17 }
 0x69f   :  { %v2042_v19 = vpop.eup %2041 }
 0x6a0   :  { %v1338_v20 = vmul.f32 %v2042_v19, %v2040_v0 }
 0x6a2   :  { %v1339_v21 = vpack.c.bf16 %v1338_v20, %v1338_v20  ;;  %v2924_v20 = vld [vmem:[#allocation36_spill] sm:$0xff] }
 0x6a4   :  { %1373 = vmatmul.mubr.bf16.vlgmr.msra.gmra.mrb[40].mxu0 %v1339_v21  ;;  %1414 = vmatmul.mubr.bf16.vlgmr.msra.gmra.mrb[40].mxu1 %v1339_v21 }
 0x6a5   :  { %1452 = vmatpush1.bf16.msra.mxu0 %v2742_v32  ;;  %1493 = vmatpush1.bf16.msra.mxu1 %v2745_v44  ;;  %v2106_v32 = vld [vmem:[#allocation9 + $0xe8] ss:$16 sps:$4 sm:$0xff]  }
 0x6a6   :  { %1453 = vmatprep.subr.bf16.mxu0 %v2748_v62  ;;  %1494 = vmatprep.subr.bf16.mxu1 %v2751_v29  ;;  %v2918_v29 = vld [vmem:[#allocation30_spill] sm:$0xff] }
 0x6a7   :  { %1483 = vmatprep.mubr.bf16.mxu0 %v2904_v30  ;;  %1524 = vmatprep.mubr.bf16.mxu1 %v2904_v30  ;;  %v2097_v30 = vld [vmem:[#allocation9 + $0xa0] ss:$16 sps:$4 sm:$0xff]  }
 0x6a9   :  { %1454 = vmatpush1.bf16.msra.mxu0 %v2756_v25  ;;  %1495 = vmatpush1.bf16.msra.mxu1 %v2759_v11  ;;  %v2919_v11 = vld [vmem:[#allocation31_spill] sm:$0xff] }
 0x6aa   :  { %1455 = vmatprep.subr.bf16.mxu0 %v2762_v22  ;;  %1496 = vmatprep.subr.bf16.mxu1 %v2765_v35 }
 0x6ad   :  { %1456 = vmatpush1.bf16.msra.mxu0 %v2768_v13  ;;  %1497 = vmatpush1.bf16.msra.mxu1 %v2771_v8  ;;  %v2920_v8 = vld [vmem:[#allocation32_spill] sm:$0xff] }
 0x6ae   :  { %1457 = vmatprep.subr.bf16.mxu0 %v2774_v12  ;;  %1498 = vmatprep.subr.bf16.mxu1 %v2777_v7  ;;  %v2921_v7 = vld [vmem:[#allocation33_spill] sm:$0xff] }
 0x6b1   :  { %1458 = vmatpush1.bf16.msra.mxu0 %v2780_v23  ;;  %1499 = vmatpush1.bf16.msra.mxu1 %v2783_v10 }
 0x6b2   :  { %1459 = vmatprep.subr.bf16.mxu0 %v2786_v31  ;;  %1500 = vmatprep.subr.bf16.mxu1 %v2789_v15 }
 0x6b5   :  { %1460 = vmatpush1.bf16.msra.mxu0 %v2792_v38  ;;  %1501 = vmatpush1.bf16.msra.mxu1 %v2795_v39 }
 0x6b6   :  { %1461 = vmatprep.subr.bf16.mxu0 %v2798_v40  ;;  %1502 = vmatprep.subr.bf16.mxu1 %v2801_v41 }
 0x6b9   :  { %1462 = vmatpush1.bf16.msra.mxu0 %v2097_v30  ;;  %1503 = vmatpush1.bf16.msra.mxu1 %v2098_v27  ;;  %v2925_v30 = vld [vmem:[#allocation37_spill] sm:$0xff] }
 0x6ba   :  { %1463 = vmatprep.subr.bf16.mxu0 %v2099_v9  ;;  %1504 = vmatprep.subr.bf16.mxu1 %v2100_v24 }
 0x6bd   :  { %1464 = vmatpush1.bf16.msra.mxu0 %v2101_v26  ;;  %1505 = vmatpush1.bf16.msra.mxu1 %v2102_v28 }
 0x6be   :  { %1465 = vmatprep.subr.bf16.mxu0 %v2103_v53  ;;  %1506 = vmatprep.subr.bf16.mxu1 %v2104_v33 }
 0x6c1   :  { %1466 = vmatpush1.bf16.msra.mxu0 %v2105_v34  ;;  %1507 = vmatpush1.bf16.msra.mxu1 %v2106_v32 }
 0x6c2   :  { %1806 = vmatprep.subr.bf16.mxu0 %v2235_v36 }
 0x777   :  { %v1374_v44 = vpop.f32.mrb[40].mxu0  ;;  %v1415_v62 = vpop.f32.mrb[40].mxu1 }
 0x778   :  { %v1422_v25 = vadd.f32 %v1374_v44, %v2918_v29  ;;  %v1424_v22 = vadd.f32 %v1415_v62, %v2919_v11  ;;  %v1376_v35 = vpop.f32.mrb[41].mxu0  ;;  %v1417_v13 = vpop.f32.mrb[41].mxu1 }
 0x779   :  { %v1423_v12 = vadd.f32 %v1376_v35, %v2920_v8  ;;  %v1425_v23 = vadd.f32 %v1417_v13, %v2921_v7  ;;  %v1378_v10 = vpop.f32.mrb[42].mxu0  ;;  %v1419_v31 = vpop.f32.mrb[42].mxu1 }
 0x77a   :  { %v1782_v15 = vmul.f32 -1.442695, %v1422_v25  ;;  %v1379_v38 = vpop.f32.mrb[43].mxu0  ;;  %v1420_v39 = vpop.f32.mrb[43].mxu1  ;;  %v1784_v41 = vmul.f32 -1.442695, %v1424_v22 }
 0x77b   :  { %v1783_v40 = vmul.f32 -1.442695, %v1423_v12  ;;  %v1788_v38 = vld [vmem:[%s2879_s5] ss:$0 sm:$0xff] }
 0x77c   :  { %2043 = vpow2.f32 %v1782_v15 }
 0x77d   :  { %2045 = vpow2.f32 %v1783_v40 }
 0x77e   :  { %2047 = vtanh.f32 %v1425_v23 }
 0x77f   :  { %2049 = vpow2.f32 %v1784_v41 }
 0x786   :  { %v2044_v58 = vpop.eup %2043 }
 0x787   :  { %v1435_v59 = vadd.f32 1.0, %v2044_v58  ;;  %v2046_v60 = vpop.eup %2045 }
 0x788   :  { %v1436_v61 = vadd.f32 1.0, %v2046_v60  ;;  %v2048_v42 = vpop.eup %2047 }
 0x789   :  { %2051 = vrcp.f32 %v1435_v59  ;;  %v2050_v63 = vpop.eup %2049 }
 0x78a   :  { %2053 = vrcp.f32 %v1436_v61  ;;  %v1437_v2 = vadd.f32 1.0, %v2050_v63 }
 0x78c   :  { %2055 = vrcp.f32 %v1437_v2 }
 0x793   :  { %v2052_v43 = vpop.eup %2051 }
 0x794   :  { %v1446_v1 = vmul.f32 %v2052_v43, %v2048_v42  ;;  %v2054_v45 = vpop.eup %2053 }
 0x795   :  { %v1445_v46 = vmul.f32 %v2054_v45, %v2821_v17 }
 0x796   :  { %v2056_v47 = vpop.eup %2055 }
 0x797   :  { %v2851_v3 = vadd.f32 %v1446_v1, %v1445_v46 }
 0x799   :  { %2057 = vtanh.f32 %v2851_v3 }
 0x7a3   :  { %v2058_v4 = vpop.eup %2057 }
 0x7a4   :  { %v1449_v48 = vmul.f32 %v2058_v4, %v2056_v47 }
 0x7a6   :  { %v1450_v5 = vpack.c.bf16 %v1449_v48, %v1449_v48 }
 0x7a8   :  { %1484 = vmatmul.mubr.bf16.vlgmr.msra.gmra.mrb[44].mxu0 %v1450_v5  ;;  %1525 = vmatmul.mubr.bf16.vlgmr.msra.gmra.mrb[44].mxu1 %v1450_v5 }
 0x7a9   :  { %1807 = vmatpush3.bf16.msra.mxu0 %v1939_v49  ;;  %1822 = vmatprep.mubr.msk.bf16.mxu0 %vm2236_vm0, %v2235_v36 }
 0x7aa   :  { %1808 = vmatprep.subr.bf16.mxu0 %v2235_v36 }
 0x7ad   :  { %1809 = vmatpush3.bf16.msra.mxu0 %v1940_v37 }
 0x7ae   :  { %1810 = vmatprep.subr.bf16.mxu0 %v2235_v36 }
 0x7b1   :  { %1811 = vmatpush3.bf16.msra.mxu0 %v1941_v50 }
 0x7b2   :  { %1812 = vmatprep.subr.bf16.mxu0 %v2235_v36 }
 0x7b5   :  { %1813 = vmatpush3.bf16.msra.mxu0 %v1942_v51 }
 0x7b6   :  { %1814 = vmatprep.subr.bf16.mxu0 %v2235_v36 }
 0x7b9   :  { %1815 = vmatpush3.bf16.msra.mxu0 %v1943_v52 }
 0x7ba   :  { %1816 = vmatprep.subr.bf16.mxu0 %v2235_v36 }
 0x7bd   :  { %1817 = vmatpush3.bf16.msra.mxu0 %v1944_v54 }
 0x7be   :  { %1818 = vmatprep.subr.bf16.mxu0 %v2235_v36 }
 0x7c1   :  { %1819 = vmatpush3.bf16.msra.mxu0 %v1945_v55 }
 0x7c2   :  { %1820 = vmatprep.subr.bf16.mxu0 %v2235_v36 }
 0x7c5   :  { %1821 = vmatpush3.bf16.msra.mxu0 %v1946_v56 }
 0x87b   :  { %v1485_v57 = vpop.f32.mrb[44].mxu0  ;;  %v1526_v6 = vpop.f32.mrb[44].mxu1 }
 0x87c   :  { %v1533_v16 = vadd.f32 %v1485_v57, %v2922_v14  ;;  %v1535_v17 = vadd.f32 %v1526_v6, %v2923_v18  ;;  %v1487_v0 = vpop.f32.mrb[45].mxu0  ;;  %v1528_v19 = vpop.f32.mrb[45].mxu1 }
 0x87d   :  { %v1534_v21 = vadd.f32 %v1487_v0, %v2924_v20  ;;  %v1536_v27 = vadd.f32 %v1528_v19, %v2925_v30  ;;  %v1489_v9 = vpop.f32.mrb[46].mxu0  ;;  %v1530_v24 = vpop.f32.mrb[46].mxu1 }
 0x87e   :  { %v1785_v26 = vmul.f32 -1.442695, %v1533_v16  ;;  %v1490_v28 = vpop.f32.mrb[47].mxu0  ;;  %v1531_v53 = vpop.f32.mrb[47].mxu1  ;;  %v1787_v34 = vmul.f32 -1.442695, %v1535_v17 }
 0x87f   :  { %v1786_v33 = vmul.f32 -1.442695, %v1534_v21 }
 0x880   :  { %2059 = vpow2.f32 %v1785_v26 }
 0x881   :  { %2061 = vpow2.f32 %v1786_v33 }
 0x882   :  { %2063 = vtanh.f32 %v1536_v27 }
 0x883   :  { %2065 = vpow2.f32 %v1787_v34 }
 0x88a   :  { %v2060_v32 = vpop.eup %2059 }
 0x88b   :  { %v1546_v44 = vadd.f32 1.0, %v2060_v32  ;;  %v2062_v62 = vpop.eup %2061 }
 0x88c   :  { %v1547_v29 = vadd.f32 1.0, %v2062_v62  ;;  %v2064_v25 = vpop.eup %2063 }
 0x88d   :  { %2067 = vrcp.f32 %v1546_v44  ;;  %v2066_v11 = vpop.eup %2065 }
 0x88e   :  { %2069 = vrcp.f32 %v1547_v29  ;;  %v1548_v8 = vadd.f32 1.0, %v2066_v11 }
 0x890   :  { %2071 = vrcp.f32 %v1548_v8 }
 0x897   :  { %v2068_v22 = vpop.eup %2067 }
 0x898   :  { %v1557_v35 = vmul.f32 %v2068_v22, %v2064_v25  ;;  %v2070_v13 = vpop.eup %2069 }
 0x899   :  { %v1556_v12 = vmul.f32 %v2070_v13, %v2851_v3 }
 0x89a   :  { %v2072_v23 = vpop.eup %2071 }
 0x89b   :  { %v1558_v7 = vadd.f32 %v1557_v35, %v1556_v12 }
 0x89d   :  { %2073 = vtanh.f32 %v1558_v7 }
 0x8a7   :  { %v2074_v10 = vpop.eup %2073 }
 0x8a8   :  { %v1560_v31 = vmul.f32 %v2074_v10, %v2072_v23 }
 0x8aa   :  { %v1566_v15 = vpack.c.bf16 %v1560_v31, %v1560_v31 }
 0x8ac   :  { %1823 = vmatmul.mubr.bf16.vlgmr.msra.gmra.mrb[48].mxu0 %v1566_v15 }
 0x97f   :  { %v1672_v39 = vpop.f32.mrb[48].mxu0 }
 0x980   :  { %v1673_v40 = vadd.f32 %v1788_v38, %v1672_v39  ;;  %v1824_v41 = vpop.f32.mrb[49].mxu0 }
 0x981   :  { %v1675_v58 = vpop.f32.mrb[50].mxu0 }
 0x982   :  { %1678 = vst [vmem:[#allocation12] sm:$0xff] %v1673_v40  ;;  %v1825_v59 = vpop.f32.mrb[51].mxu0 }
 0x983   :  { %2206 = shalt.err (!%p2203_p8)
}
 0x984   :  { %s2207_s5 = scalar_lea.hbm %s2880_s6, 128 }
 0x985   :  { %p2208_p9 = scmp.ne.s32.totalorder %s2880_s6, %s2207_s5  ;;  %p2211_p10 = scmp.lt.u32.totalorder %s2207_s5, %s2880_s6 }
 0x987   :  { %p2213_p11 = pnand %p2211_p10, %p2208_p9 }
 0x989   :  { %2216 = shalt.err (!%p2213_p11)
}
 0x98a   :  { %1688 = dma.vmem_to_hbm [thread:$0]  %s1686_s24, 128, %s2880_s6, [#allocation6]  }
 0x98b   :  { %2223 = dma.done.wait [#allocation6], 128  }
 0x98c   :  { %2224 = vsyncadd [#allocation6], 4294967168 }
 0x98d   :  { %1692 = vsyncpa [#allocation5], 1 }
 0x98e   :  { %1693 = vsyncpa [#allocation8], 1 }
 0x98f   :  { %1694 = vsyncpa [#allocation11], 1 }
 0x990   :  { %1695 = vsyncpa [#allocation6], 1 }

</bundles_post_ra>
